<compile_context>
chip_gen: v5e
topology: v5e:2x2
jax: 0.10.0
libtpu: 0.0.40
codegen_flags: <defaults>
</compile_context>

<pallas_src>
import jax
import jax.numpy as jnp
import numpy as np
from jax import lax
from jax.experimental import pallas as pl
from jax.experimental.pallas import tpu as pltpu

KSIZE = 7
PAD = 3


def _make_kernel(HW, Bt):
    def kernel(x_ref, w1t_ref, w2t_ref, toep_ref, bias_ref, o_ref):
        # x_ref: (Bt, C, HWp) VMEM | w1t_ref: (C, Cr) | w2t_ref: (Cr, C)
        # toep_ref: (2*HWp, HWp) f32 Toeplitz with zero padding baked in
        # bias_ref: (1,) SMEM conv bias
        x = x_ref[...]                                   # (Bt, C, HWp), native dtype
        HWp = x.shape[-1]

        # ---------------- channel attention ----------------
        if HWp != HW:
            lane = lax.broadcasted_iota(jnp.int32, x.shape, dimension=2)
            x_for_max = jnp.where(lane < HW, x, jnp.asarray(-jnp.inf, x.dtype))
        else:
            x_for_max = x
        # lane reductions over spatial; accumulate in f32 (padded lanes are 0).
        avg = jnp.sum(x, axis=-1, dtype=jnp.float32) * (1.0 / HW)        # (Bt, C)
        mx = jnp.max(x_for_max, axis=-1).astype(jnp.float32)             # (Bt, C)
        pooled = jnp.concatenate([avg, mx], axis=0)                      # (2*Bt, C)

        # shared MLP batched over [avg|max] x batch -> one pair of matmuls.
        w1t = w1t_ref[...].astype(jnp.float32)                           # (C, Cr)
        w2t = w2t_ref[...].astype(jnp.float32)                           # (Cr, C)
        h = jnp.maximum(
            jnp.dot(pooled, w1t, preferred_element_type=jnp.float32), 0.0)   # (2Bt, Cr)
        y = jnp.dot(h, w2t, preferred_element_type=jnp.float32)              # (2Bt, C)
        ca = jax.nn.sigmoid(y[:Bt] + y[Bt:])                                 # (Bt, C)

        # attention map cast to input dtype (exact for f32 inputs).
        # TODO(synk): for bf16 inputs keep products in f32 and cast once at the end.
        out1 = x * ca[:, :, None].astype(x.dtype)                        # (Bt, C, HWp)

        # ---------------- spatial attention ----------------
        # channel reductions keep the maps as (Bt, HWp) lane vectors — no reshape.
        avg_s = jnp.mean(out1, axis=1, dtype=jnp.float32)                # (Bt, HWp)
        max_s = jnp.max(out1, axis=1).astype(jnp.float32)                # (Bt, HWp)
        comb = jnp.concatenate([avg_s, max_s], axis=-1)                  # (Bt, 2*HWp)

        # 7x7 conv over the 2-channel [avg, max] map == ONE Toeplitz matmul.
        acc = jnp.dot(comb, toep_ref[...],
                      preferred_element_type=jnp.float32)                # (Bt, HWp)
        sa = jax.nn.sigmoid(acc + bias_ref[0])                           # (Bt, HWp)

        o_ref[...] = (out1 * sa[:, None, :].astype(out1.dtype)).astype(o_ref.dtype)

    return kernel


def _build_toeplitz(wconv_flat, H, W, HWp):
    """(2*HWp, HWp) matrix T so that [avg|max] (1,2*HWp) @ T == conv2d(pad=3) output.

    Zero padding of the conv is baked in: out-of-bounds taps are simply left at
    zero; rows/cols for the lane-padding region (>= H*W) stay zero as well.
    """
    w = np.asarray(wconv_flat, np.float32).reshape(2, KSIZE, KSIZE)
    T = np.zeros((2 * HWp, HWp), np.float32)
    for ci in range(2):
        for ki in range(KSIZE):
            for kj in range(KSIZE):
                tap = w[ci, ki, kj]
                for oh in range(H):
                    ih = oh + ki - PAD
                    if not (0 <= ih < H):
                        continue
                    for ow in range(W):
                        iw = ow + kj - PAD
                        if not (0 <= iw < W):
                            continue
                        T[ci * HWp + ih * W + iw, oh * W + ow] = tap
    return jnp.asarray(T)


def _pick_bt(B, C, HWp, itemsize, budget=20 << 20):
    """Largest divisor of B whose merged block + f32 temps fit a VMEM budget."""
    per_b = C * HWp * (4 * itemsize + 3 * 4)   # 2x(in+out) buffers + f32 temps
    bt = int(max(1, min(B, budget // max(per_b, 1))))
    while B % bt:
        bt -= 1
    return bt


def cbam_forward(x, w1, w2, wconv_flat, bias):
    B, C, H, W = x.shape
    Cr = w1.shape[0]
    HW = H * W
    HWp = max(128, ((HW + 127) // 128) * 128)        # lane-dense, unmasked vst
    itemsize = jnp.dtype(x.dtype).itemsize

    x2 = x.reshape(B, C, HW)                         # free, contiguous in HBM
    if HWp != HW:
        x2 = jnp.pad(x2, ((0, 0), (0, 0), (0, HWp - HW)))

    w1t = jnp.asarray(w1).T                          # (C, Cr)
    w2t = jnp.asarray(w2).T                          # (Cr, C)
    toep = _build_toeplitz(wconv_flat, H, W, HWp)    # (2*HWp, HWp) f32
    bias_arr = jnp.asarray(bias, jnp.float32).reshape(1)

    Bt = _pick_bt(B, C, HWp, itemsize)
    # TODO(synk): on v7x prefer Bt = B // 2 (grid length >= 2) so both TensorCores
    #             get work; on single-TC v5e/v6e the fully merged grid used here wins.
    grid = (B // Bt,)

    # Explicit VMEM budget: double-buffered in+out blocks + Toeplitz + f32 temps.
    block_bytes = Bt * C * HWp * itemsize
    budget = (4 * block_bytes                 # 2 buffers x (in + out)
              + 2 * toep.size * 4             # Toeplitz (worst case double-buffered)
              + 3 * Bt * C * HWp * 4          # in-kernel f32 temporaries headroom
              + (2 << 20))
    vmem_limit = int(min(max(budget, 4 << 20), 48 << 20))   # leave v7x headroom

    kernel = _make_kernel(HW, Bt)
    out_shape = jax.ShapeDtypeStruct((B, C, HWp), x.dtype)
    cparams = pltpu.CompilerParams(
        dimension_semantics=("parallel",),
        vmem_limit_bytes=vmem_limit,
    )

    def run(single_buffer_weights):
        wkw = ({"pipeline_mode": pl.Buffered(buffer_count=1)}
               if single_buffer_weights else {})
        return pl.pallas_call(
            kernel,
            out_shape=out_shape,
            grid=grid,
            in_specs=[
                pl.BlockSpec((Bt, C, HWp), lambda i: (i, 0, 0)),
                pl.BlockSpec((C, Cr), lambda i: (0, 0), **wkw),
                pl.BlockSpec((Cr, C), lambda i: (0, 0), **wkw),
                pl.BlockSpec((2 * HWp, HWp), lambda i: (0, 0), **wkw),
                pl.BlockSpec(memory_space=pltpu.MemorySpace.SMEM),
            ],
            out_specs=pl.BlockSpec((Bt, C, HWp), lambda i: (i, 0, 0)),
            compiler_params=cparams,
        )(x2, w1t, w2t, toep, bias_arr)

    try:
        out = run(True)
    except Exception:
        # pl.Buffered(1) unsupported on this jax build; fall back to default
        # double-buffered weights (costs ~toep-sized extra VMEM only).
        out = run(False)

    if HWp != HW:
        out = out[:, :, :HW]
    return out.reshape(B, C, H, W)


def cbam_ref(x, w1, w2, wsp_flat):
    """Pure-JAX reference matching the PyTorch module semantics."""
    wconv = wsp_flat[: 2 * KSIZE * KSIZE].reshape(1, 2, KSIZE, KSIZE)
    bias = wsp_flat[2 * KSIZE * KSIZE]
    avg = x.mean(axis=(2, 3))
    mx = x.max(axis=(2, 3))

    def mlp(v):
        return jnp.maximum(v @ w1.T, 0.0) @ w2.T

    ca = jax.nn.sigmoid(mlp(avg) + mlp(mx))[:, :, None, None]
    out1 = x * ca
    sp = jnp.concatenate(
        [out1.mean(axis=1, keepdims=True), out1.max(axis=1, keepdims=True)], axis=1
    )
    conv = lax.conv_general_dilated(
        sp, wconv, (1, 1), [(PAD, PAD), (PAD, PAD)],
        dimension_numbers=("NCHW", "OIHW", "NCHW"),
    ) + bias
    return out1 * jax.nn.sigmoid(conv)


if __name__ == "__main__":
    key = jax.random.PRNGKey(0)
    k1, k2, k3, k4, k5 = jax.random.split(key, 5)

    B, C, H, W = 2, 32, 16, 16         # channel=32, ratio=16 -> hidden=2
    ratio = 16
    Cr = C // ratio

    x = jax.random.normal(k1, (B, C, H, W), jnp.float32)
    # shared MLP: Conv2d(C, C//r, 1, bias=False) and Conv2d(C//r, C, 1, bias=False)
    w1 = jax.random.normal(k2, (Cr, C), jnp.float32) * 0.1
    w2 = jax.random.normal(k3, (C, Cr), jnp.float32) * 0.1
    # spatial Conv2d(2, 1, 7, padding=3, bias=True): [avg-ch taps, max-ch taps], bias
    wconv = jax.random.normal(k4, (2 * KSIZE * KSIZE,), jnp.float32) * 0.05
    bias = jax.random.normal(k5, (1,), jnp.float32) * 0.05
    wsp_flat = jnp.concatenate([wconv, bias])

    out = cbam_forward(x, w1, w2, wconv, bias)
    jax.block_until_ready(out)

    ref = cbam_ref(x, w1, w2, wsp_flat)
    np.testing.assert_allclose(np.asarray(out), np.asarray(ref), rtol=1e-4, atol=1e-4)
    print("KERNEL_OK")
</pallas_src>

<mosaic_0001>
module attributes {stable_mosaic.version = 11 : i64} {
  func.func @kernel(%arg0: i32, %arg1: memref<2x32x256xf32, #tpu.memory_space<vmem>>, %arg2: memref<32x2xf32, #tpu.memory_space<vmem>>, %arg3: memref<2x32xf32, #tpu.memory_space<vmem>>, %arg4: memref<512x256xf32, #tpu.memory_space<vmem>>, %arg5: memref<1xf32, #tpu.memory_space<smem>>, %arg6: memref<2x32x256xf32, #tpu.memory_space<vmem>>) attributes {dimension_semantics = [#tpu.dimension_semantics<parallel>], iteration_bounds = array<i64: 1>, scalar_prefetch = 0 : i64, scratch_operands = 0 : i64, tpu.core_type = #tpu.core_type<tc>, window_params = [{transform_indices = @transform_0, window_bounds = array<i64: 2, 32, 256>}, {pipeline_mode = #tpu.pipeline_mode<synchronous>, transform_indices = @transform_1, window_bounds = array<i64: 32, 2>}, {pipeline_mode = #tpu.pipeline_mode<synchronous>, transform_indices = @transform_2, window_bounds = array<i64: 2, 32>}, {pipeline_mode = #tpu.pipeline_mode<synchronous>, transform_indices = @transform_3, window_bounds = array<i64: 512, 256>}, {transform_indices = @transform_4, window_bounds = array<i64: 1>}, {transform_indices = @transform_5, window_bounds = array<i64: 2, 32, 256>}]} {
    %c0 = arith.constant 0 : index
    %c0_0 = arith.constant 0 : index
    %c0_1 = arith.constant 0 : index
    %0 = vector.load %arg1[%c0, %c0_0, %c0_1] : memref<2x32x256xf32, #tpu.memory_space<vmem>>, vector<2x32x256xf32>
    %cst = arith.constant dense<0.000000e+00> : vector<2x32xf32>
    %1 = vector.multi_reduction <add>, %0, %cst [2] : vector<2x32x256xf32> to vector<2x32xf32>
    %cst_2 = arith.constant 3.906250e-03 : f32
    %2 = vector.broadcast %cst_2 : f32 to vector<2x32xf32>
    %3 = arith.mulf %1, %2 : vector<2x32xf32>
    %cst_3 = arith.constant dense<0xFF800000> : vector<2x32xf32>
    %4 = vector.multi_reduction <maximumf>, %0, %cst_3 [2] : vector<2x32x256xf32> to vector<2x32xf32>
    %5 = tpu.concatenate %3, %4 in 0 : vector<2x32xf32>, vector<2x32xf32> -> vector<4x32xf32>
    %c0_4 = arith.constant 0 : index
    %c0_5 = arith.constant 0 : index
    %6 = vector.load %arg2[%c0_4, %c0_5] : memref<32x2xf32, #tpu.memory_space<vmem>>, vector<32x2xf32>
    %c0_6 = arith.constant 0 : index
    %c0_7 = arith.constant 0 : index
    %7 = vector.load %arg3[%c0_6, %c0_7] : memref<2x32xf32, #tpu.memory_space<vmem>>, vector<2x32xf32>
    %cst_8 = arith.constant dense<0.000000e+00> : vector<4x2xf32>
    %8 = tpu.matmul %5, %6, %cst_8 {dimension_numbers = #tpu.dot_dimension_numbers<[1], [0], [0], [1], [0, 0, 1, 1], [], []>} : vector<4x32xf32>, vector<32x2xf32>, vector<4x2xf32> -> vector<4x2xf32>
    %cst_9 = arith.constant 0.000000e+00 : f32
    %9 = vector.broadcast %cst_9 : f32 to vector<4x2xf32>
    %10 = arith.maximumf %8, %9 : vector<4x2xf32>
    %cst_10 = arith.constant dense<0.000000e+00> : vector<4x32xf32>
    %11 = tpu.matmul %10, %7, %cst_10 {dimension_numbers = #tpu.dot_dimension_numbers<[1], [0], [0], [1], [0, 0, 1, 1], [], []>} : vector<4x2xf32>, vector<2x32xf32>, vector<4x32xf32> -> vector<4x32xf32>
    %12 = vector.extract_strided_slice %11 {offsets = [0, 0], sizes = [2, 32], strides = [1, 1]} : vector<4x32xf32> to vector<2x32xf32>
    %13 = vector.extract_strided_slice %11 {offsets = [2, 0], sizes = [2, 32], strides = [1, 1]} : vector<4x32xf32> to vector<2x32xf32>
    %14 = arith.addf %12, %13 : vector<2x32xf32>
    %15 = arith.negf %14 : vector<2x32xf32>
    %16 = math.exp %15 : vector<2x32xf32>
    %cst_11 = arith.constant 1.000000e+00 : f32
    %17 = vector.broadcast %cst_11 : f32 to vector<2x32xf32>
    %18 = arith.addf %17, %16 : vector<2x32xf32>
    %19 = arith.divf %17, %18 : vector<2x32xf32>
    %20 = vector.shape_cast %19 : vector<2x32xf32> to vector<2x32x1xf32>
    %21 = vector.broadcast %20 : vector<2x32x1xf32> to vector<2x32x256xf32>
    %22 = arith.mulf %0, %21 : vector<2x32x256xf32>
    %cst_12 = arith.constant dense<0.000000e+00> : vector<2x256xf32>
    %23 = vector.multi_reduction <add>, %22, %cst_12 [1] : vector<2x32x256xf32> to vector<2x256xf32>
    %cst_13 = arith.constant 3.200000e+01 : f32
    %24 = vector.broadcast %cst_13 : f32 to vector<2x256xf32>
    %25 = arith.divf %23, %24 : vector<2x256xf32>
    %cst_14 = arith.constant dense<0xFF800000> : vector<2x256xf32>
    %26 = vector.multi_reduction <maximumf>, %22, %cst_14 [1] : vector<2x32x256xf32> to vector<2x256xf32>
    %27 = tpu.concatenate %25, %26 in 1 : vector<2x256xf32>, vector<2x256xf32> -> vector<2x512xf32>
    %c0_15 = arith.constant 0 : index
    %c0_16 = arith.constant 0 : index
    %28 = vector.load %arg4[%c0_15, %c0_16] : memref<512x256xf32, #tpu.memory_space<vmem>>, vector<512x256xf32>
    %cst_17 = arith.constant dense<0.000000e+00> : vector<2x256xf32>
    %29 = tpu.matmul %27, %28, %cst_17 {dimension_numbers = #tpu.dot_dimension_numbers<[1], [0], [0], [1], [0, 0, 1, 1], [], []>} : vector<2x512xf32>, vector<512x256xf32>, vector<2x256xf32> -> vector<2x256xf32>
    %c0_18 = arith.constant 0 : index
    %30 = memref.load %arg5[%c0_18] : memref<1xf32, #tpu.memory_space<smem>>
    %31 = vector.broadcast %30 : f32 to vector<2x256xf32>
    %32 = arith.addf %29, %31 : vector<2x256xf32>
    %33 = arith.negf %32 : vector<2x256xf32>
    %34 = math.exp %33 : vector<2x256xf32>
    %cst_19 = arith.constant 1.000000e+00 : f32
    %35 = vector.broadcast %cst_19 : f32 to vector<2x256xf32>
    %36 = arith.addf %35, %34 : vector<2x256xf32>
    %37 = arith.divf %35, %36 : vector<2x256xf32>
    %38 = vector.shape_cast %37 : vector<2x256xf32> to vector<2x1x256xf32>
    %39 = vector.broadcast %38 : vector<2x1x256xf32> to vector<2x32x256xf32>
    %40 = arith.mulf %22, %39 : vector<2x32x256xf32>
    %c0_20 = arith.constant 0 : index
    %c0_21 = arith.constant 0 : index
    %c0_22 = arith.constant 0 : index
    %41 = vector.load %arg6[%c0_20, %c0_21, %c0_22] : memref<2x32x256xf32, #tpu.memory_space<vmem>>, vector<2x32x256xf32>
    tpu.vector_store %arg6[%c0_20, %c0_21, %c0_22], %40 {strides = array<i32>} : memref<2x32x256xf32, #tpu.memory_space<vmem>>, vector<2x32x256xf32>,
    return
  }
  func.func @transform_0(%arg0: i32) -> (i32, i32, i32) {
    %c0_i32 = arith.constant 0 : i32
    %c0_i32_0 = arith.constant 0 : i32
    %c0_i32_1 = arith.constant 0 : i32
    return %arg0, %c0_i32, %c0_i32_0 : i32, i32, i32
  }
  func.func @transform_1(%arg0: i32) -> (i32, i32) {
    %c0_i32 = arith.constant 0 : i32
    %c0_i32_0 = arith.constant 0 : i32
    %c0_i32_1 = arith.constant 0 : i32
    return %c0_i32, %c0_i32_0 : i32, i32
  }
  func.func @transform_2(%arg0: i32) -> (i32, i32) {
    %c0_i32 = arith.constant 0 : i32
    %c0_i32_0 = arith.constant 0 : i32
    %c0_i32_1 = arith.constant 0 : i32
    return %c0_i32, %c0_i32_0 : i32, i32
  }
  func.func @transform_3(%arg0: i32) -> (i32, i32) {
    %c0_i32 = arith.constant 0 : i32
    %c0_i32_0 = arith.constant 0 : i32
    %c0_i32_1 = arith.constant 0 : i32
    return %c0_i32, %c0_i32_0 : i32, i32
  }
  func.func @transform_4(%arg0: i32) -> i32 {
    %c0_i32 = arith.constant 0 : i32
    %c0_i32_0 = arith.constant 0 : i32
    return %c0_i32 : i32
  }
  func.func @transform_5(%arg0: i32) -> (i32, i32, i32) {
    %c0_i32 = arith.constant 0 : i32
    %c0_i32_0 = arith.constant 0 : i32
    %c0_i32_1 = arith.constant 0 : i32
    return %arg0, %c0_i32, %c0_i32_0 : i32, i32, i32
  }
}

module attributes {stable_mosaic.version = 11 : i64} {
  func.func @kernel(%arg0: i32, %arg1: memref<2x32x256xf32, #tpu.memory_space<vmem>>, %arg2: memref<32x2xf32, #tpu.memory_space<vmem>>, %arg3: memref<2x32xf32, #tpu.memory_space<vmem>>, %arg4: memref<512x256xf32, #tpu.memory_space<vmem>>, %arg5: memref<1xf32, #tpu.memory_space<smem>>, %arg6: memref<2x32x256xf32, #tpu.memory_space<vmem>>) attributes {dimension_semantics = [#tpu.dimension_semantics<parallel>], iteration_bounds = array<i64: 1>, scalar_prefetch = 0 : i64, scratch_operands = 0 : i64, tpu.core_type = #tpu.core_type<tc>, window_params = [{transform_indices = @transform_0, window_bounds = array<i64: 2, 32, 256>}, {pipeline_mode = #tpu.pipeline_mode<synchronous>, transform_indices = @transform_1, window_bounds = array<i64: 32, 2>}, {pipeline_mode = #tpu.pipeline_mode<synchronous>, transform_indices = @transform_2, window_bounds = array<i64: 2, 32>}, {pipeline_mode = #tpu.pipeline_mode<synchronous>, transform_indices = @transform_3, window_bounds = array<i64: 512, 256>}, {transform_indices = @transform_4, window_bounds = array<i64: 1>}, {transform_indices = @transform_5, window_bounds = array<i64: 2, 32, 256>}]} {
    %c0 = arith.constant 0 : index
    %c0_0 = arith.constant 0 : index
    %c0_1 = arith.constant 0 : index
    %0 = vector.load %arg1[%c0, %c0_0, %c0_1] : memref<2x32x256xf32, #tpu.memory_space<vmem>>, vector<2x32x256xf32>
    %cst = arith.constant dense<0.000000e+00> : vector<2x32xf32>
    %1 = vector.multi_reduction <add>, %0, %cst [2] : vector<2x32x256xf32> to vector<2x32xf32>
    %cst_2 = arith.constant 3.906250e-03 : f32
    %2 = vector.broadcast %cst_2 : f32 to vector<2x32xf32>
    %3 = arith.mulf %1, %2 : vector<2x32xf32>
    %cst_3 = arith.constant dense<0xFF800000> : vector<2x32xf32>
    %4 = vector.multi_reduction <maximumf>, %0, %cst_3 [2] : vector<2x32x256xf32> to vector<2x32xf32>
    %5 = tpu.concatenate %3, %4 in 0 : vector<2x32xf32>, vector<2x32xf32> -> vector<4x32xf32>
    %c0_4 = arith.constant 0 : index
    %c0_5 = arith.constant 0 : index
    %6 = vector.load %arg2[%c0_4, %c0_5] : memref<32x2xf32, #tpu.memory_space<vmem>>, vector<32x2xf32>
    %c0_6 = arith.constant 0 : index
    %c0_7 = arith.constant 0 : index
    %7 = vector.load %arg3[%c0_6, %c0_7] : memref<2x32xf32, #tpu.memory_space<vmem>>, vector<2x32xf32>
    %cst_8 = arith.constant dense<0.000000e+00> : vector<4x2xf32>
    %8 = tpu.matmul %5, %6, %cst_8 {dimension_numbers = #tpu.dot_dimension_numbers<[1], [0], [0], [1], [0, 0, 1, 1], [], []>} : vector<4x32xf32>, vector<32x2xf32>, vector<4x2xf32> -> vector<4x2xf32>
    %cst_9 = arith.constant 0.000000e+00 : f32
    %9 = vector.broadcast %cst_9 : f32 to vector<4x2xf32>
    %10 = arith.maximumf %8, %9 : vector<4x2xf32>
    %cst_10 = arith.constant dense<0.000000e+00> : vector<4x32xf32>
    %11 = tpu.matmul %10, %7, %cst_10 {dimension_numbers = #tpu.dot_dimension_numbers<[1], [0], [0], [1], [0, 0, 1, 1], [], []>} : vector<4x2xf32>, vector<2x32xf32>, vector<4x32xf32> -> vector<4x32xf32>
    %12 = vector.extract_strided_slice %11 {offsets = [0, 0], sizes = [2, 32], strides = [1, 1]} : vector<4x32xf32> to vector<2x32xf32>
    %13 = vector.extract_strided_slice %11 {offsets = [2, 0], sizes = [2, 32], strides = [1, 1]} : vector<4x32xf32> to vector<2x32xf32>
    %14 = arith.addf %12, %13 : vector<2x32xf32>
    %15 = arith.negf %14 : vector<2x32xf32>
    %16 = math.exp %15 : vector<2x32xf32>
    %cst_11 = arith.constant 1.000000e+00 : f32
    %17 = vector.broadcast %cst_11 : f32 to vector<2x32xf32>
    %18 = arith.addf %17, %16 : vector<2x32xf32>
    %19 = arith.divf %17, %18 : vector<2x32xf32>
    %20 = vector.shape_cast %19 : vector<2x32xf32> to vector<2x32x1xf32>
    %21 = vector.broadcast %20 : vector<2x32x1xf32> to vector<2x32x256xf32>
    %22 = arith.mulf %0, %21 : vector<2x32x256xf32>
    %cst_12 = arith.constant dense<0.000000e+00> : vector<2x256xf32>
    %23 = vector.multi_reduction <add>, %22, %cst_12 [1] : vector<2x32x256xf32> to vector<2x256xf32>
    %cst_13 = arith.constant 3.200000e+01 : f32
    %24 = vector.broadcast %cst_13 : f32 to vector<2x256xf32>
    %25 = arith.divf %23, %24 : vector<2x256xf32>
    %cst_14 = arith.constant dense<0xFF800000> : vector<2x256xf32>
    %26 = vector.multi_reduction <maximumf>, %22, %cst_14 [1] : vector<2x32x256xf32> to vector<2x256xf32>
    %27 = tpu.concatenate %25, %26 in 1 : vector<2x256xf32>, vector<2x256xf32> -> vector<2x512xf32>
    %c0_15 = arith.constant 0 : index
    %c0_16 = arith.constant 0 : index
    %28 = vector.load %arg4[%c0_15, %c0_16] : memref<512x256xf32, #tpu.memory_space<vmem>>, vector<512x256xf32>
    %cst_17 = arith.constant dense<0.000000e+00> : vector<2x256xf32>
    %29 = tpu.matmul %27, %28, %cst_17 {dimension_numbers = #tpu.dot_dimension_numbers<[1], [0], [0], [1], [0, 0, 1, 1], [], []>} : vector<2x512xf32>, vector<512x256xf32>, vector<2x256xf32> -> vector<2x256xf32>
    %c0_18 = arith.constant 0 : index
    %30 = memref.load %arg5[%c0_18] : memref<1xf32, #tpu.memory_space<smem>>
    %31 = vector.broadcast %30 : f32 to vector<2x256xf32>
    %32 = arith.addf %29, %31 : vector<2x256xf32>
    %33 = arith.negf %32 : vector<2x256xf32>
    %34 = math.exp %33 : vector<2x256xf32>
    %cst_19 = arith.constant 1.000000e+00 : f32
    %35 = vector.broadcast %cst_19 : f32 to vector<2x256xf32>
    %36 = arith.addf %35, %34 : vector<2x256xf32>
    %37 = arith.divf %35, %36 : vector<2x256xf32>
    %38 = vector.shape_cast %37 : vector<2x256xf32> to vector<2x1x256xf32>
    %39 = vector.broadcast %38 : vector<2x1x256xf32> to vector<2x32x256xf32>
    %40 = arith.mulf %22, %39 : vector<2x32x256xf32>
    %c0_20 = arith.constant 0 : index
    %c0_21 = arith.constant 0 : index
    %c0_22 = arith.constant 0 : index
    %41 = vector.load %arg6[%c0_20, %c0_21, %c0_22] : memref<2x32x256xf32, #tpu.memory_space<vmem>>, vector<2x32x256xf32>
    tpu.vector_store %arg6[%c0_20, %c0_21, %c0_22], %40 {strides = array<i32>} : memref<2x32x256xf32, #tpu.memory_space<vmem>>, vector<2x32x256xf32>,
    return
  }
  func.func @transform_0(%arg0: i32) -> (i32, i32, i32) {
    %c0_i32 = arith.constant 0 : i32
    %c0_i32_0 = arith.constant 0 : i32
    %c0_i32_1 = arith.constant 0 : i32
    return %arg0, %c0_i32, %c0_i32_0 : i32, i32, i32
  }
  func.func @transform_1(%arg0: i32) -> (i32, i32) {
    %c0_i32 = arith.constant 0 : i32
    %c0_i32_0 = arith.constant 0 : i32
    %c0_i32_1 = arith.constant 0 : i32
    return %c0_i32, %c0_i32_0 : i32, i32
  }
  func.func @transform_2(%arg0: i32) -> (i32, i32) {
    %c0_i32 = arith.constant 0 : i32
    %c0_i32_0 = arith.constant 0 : i32
    %c0_i32_1 = arith.constant 0 : i32
    return %c0_i32, %c0_i32_0 : i32, i32
  }
  func.func @transform_3(%arg0: i32) -> (i32, i32) {
    %c0_i32 = arith.constant 0 : i32
    %c0_i32_0 = arith.constant 0 : i32
    %c0_i32_1 = arith.constant 0 : i32
    return %c0_i32, %c0_i32_0 : i32, i32
  }
  func.func @transform_4(%arg0: i32) -> i32 {
    %c0_i32 = arith.constant 0 : i32
    %c0_i32_0 = arith.constant 0 : i32
    return %c0_i32 : i32
  }
  func.func @transform_5(%arg0: i32) -> (i32, i32, i32) {
    %c0_i32 = arith.constant 0 : i32
    %c0_i32_0 = arith.constant 0 : i32
    %c0_i32_1 = arith.constant 0 : i32
    return %arg0, %c0_i32, %c0_i32_0 : i32, i32, i32
  }
}

</mosaic_0001>

<bundles_post_ra>
// kernel: tpu_custom_call.1
= control target key start
LH: loop header
LB: loop body
LE: loop exit
PB: predicated region body
PF: predicated region fallthrough
CT: control target
= control target key end

     0   :  { %11 = vsyncpa [#allocation4], 0  ;;  %s1201_s0 = inlined_call_operand.hbm [shape: f32[2,32,256], index: 0, kind: input, shape index: {}]   ;;  %s1202_s1 = inlined_call_operand.vmem [shape: f32[32,2], index: 1, kind: input, shape index: {}]   ;;  %s1203_s2 = inlined_call_operand.vmem [shape: f32[2,32], index: 2, kind: input, shape index: {}]   ;;  %s1204_s3 = inlined_call_operand.hbm [shape: f32[512,256], index: 3, kind: input, shape index: {}]   ;;  %s1205_s4 = inlined_call_operand.<no memory space> [shape: f32[1], index: 4, kind: input, shape index: {}]   ;;  %s1206_s5 = inlined_call_operand.hbm [shape: f32[2,32,256], index: 5, kind: output, shape index: {}]  }
   0x1   :  { %12 = vsyncpa [#allocation7], 0 }
   0x2   :  { %13 = vsyncpa [#allocation5], 0  ;;  %s18_s20 = sshll.u32 %s1201_s0, 4  ;;  %s938_s21 = smov [#allocation3]   ;;  %s19_s20 = int_to_ptr.hbm [resolvable:$true] %s18_s20 }
   0x3   :  { %s20_s22 = sshll.u32 %s938_s21, 4  ;;  %s35_s25 = sshll.u32 %s1204_s3, 4  ;;  %s21_s22 = int_to_ptr.vmem [resolvable:$true] %s20_s22  ;;  %s36_s25 = int_to_ptr.hbm [resolvable:$true] %s35_s25 }
   0x4   :  { %s939_s26 = smov 256   ;;  %s940_s27 = smov 16  }
   0x5   :  { %26 = dma.hbm_to_vmem [thread:$0]  %s19_s20, 2048, %s21_s22, [#allocation4], %s939_s26, %s939_s26, %s940_s27  }
   0x6   :  { %s941_s28 = smov [#allocation6]  }
   0x7   :  { %s37_s29 = sshll.u32 %s941_s28, 4  ;;  %s38_s29 = int_to_ptr.vmem [resolvable:$true] %s37_s29 }
   0x8   :  { %43 = dma.hbm_to_vmem [thread:$0]  %s36_s25, 16384, %s38_s29, [#allocation7], %s939_s26, %s939_s26, %s940_s27  }
   0x9   :  { %932 = dma.done.wait [#allocation4], 2048  }
   0xa   :  { %933 = vsyncadd [#allocation4], 4294965248 }
   0xb   :  { %934 = dma.done.wait [#allocation7], 16384  }
   0xc   :  { %935 = vsyncadd [#allocation7], 4294950912  ;;  %v986_v0 = vld [vmem:[#allocation3 + $0x40] sm:$0xff]  ;;  %v988_v1 = vld [vmem:[#allocation3 + $0x48] sm:$0xff]  ;;  %v134_v45 = vlaneseq  ;;  %vm139_vm0 = vcmask 130112   ;;  %vm143_vm1 = vcmask 195712  }
   0xd   :  { %v990_v2 = vld [vmem:[#allocation3] sm:$0xff]  ;;  %v82_v3 = vadd.f32 %v988_v1, %v986_v0  ;;  %v994_v4 = vld [vmem:[#allocation3 + $0x8] sm:$0xff]  ;;  %v1004_v9 = vld [vmem:[#allocation3 + $0x50] sm:$0xff]  ;;  %v114_v25 = vmax.f32 %v986_v0, %v988_v1  ;;  %vm147_vm2 = vcmask 261312   ;;  %vm156_vm3 = vcmask 1041409   ;;  %s812_s16 = sshll.u32 %s1206_s5, 4  ;;  %s813_s16 = int_to_ptr.hbm [resolvable:$true] %s812_s16 }
   0xe   :  { %v996_v5 = vld [vmem:[#allocation3 + $0x20] sm:$0xff]  ;;  %v998_v6 = vld [vmem:[#allocation3 + $0x28] sm:$0xff]  ;;  %v70_v7 = vadd.f32 %v994_v4, %v990_v2  ;;  %v1006_v10 = vld [vmem:[#allocation3 + $0x58] sm:$0xff]  ;;  %v102_v24 = vmax.f32 %v990_v2, %v994_v4  ;;  %v135_v49 = vand.u32 127, %v134_v45  ;;  %vm181_vm4 = vcmask 1043459  }
   0xf   :  { %v76_v8 = vadd.f32 %v998_v6, %v996_v5  ;;  %83 = vadd.xlane.f32.xlu1 %v82_v3  ;;  %v1008_v11 = vld [vmem:[#allocation3 + $0x10] sm:$0xff]  ;;  %v1010_v12 = vld [vmem:[#allocation3 + $0x18] sm:$0xff]  ;;  %v1012_v13 = vld [vmem:[#allocation3 + $0x60] sm:$0xff]  ;;  %v85_v15 = vadd.f32 %v1006_v10, %v1004_v9  ;;  %v117_v27 = vmax.f32 %v1004_v9, %v1006_v10  ;;  %v108_v29 = vmax.f32 %v996_v5, %v998_v6 }
  0x10   :  { %71 = vadd.xlane.f32.xlu0 %v70_v7  ;;  %v1014_v14 = vld [vmem:[#allocation3 + $0x68] sm:$0xff]  ;;  %v73_v16 = vadd.f32 %v1010_v12, %v1008_v11  ;;  %v1022_v18 = vld [vmem:[#allocation3 + $0x70] sm:$0xff]  ;;  %v1024_v19 = vld [vmem:[#allocation3 + $0x78] sm:$0xff]  ;;  %v105_v26 = vmax.f32 %v1008_v11, %v1010_v12  ;;  %v137_v51 = vadd.s32 4294967288, %v135_v49  ;;  %v141_v55 = vadd.s32 4294967280, %v135_v49 }
  0x11   :  { %77 = vadd.xlane.f32.xlu2 %v76_v8  ;;  %v88_v17 = vadd.f32 %v1014_v14, %v1012_v13  ;;  %v1026_v20 = vld [vmem:[#allocation3 + $0x30] sm:$0xff]  ;;  %v1028_v21 = vld [vmem:[#allocation3 + $0x38] sm:$0xff]  ;;  %v91_v22 = vadd.f32 %v1024_v19, %v1022_v18  ;;  %v120_v28 = vmax.f32 %v1012_v13, %v1014_v14  ;;  %v123_v31 = vmax.f32 %v1022_v18, %v1024_v19  ;;  %v187_v40 = vld [vmem:[%s1202_s1 + $0x8] sm:$0xff] }
  0x12   :  { %v79_v23 = vadd.f32 %v1028_v21, %v1026_v20  ;;  %v111_v30 = vmax.f32 %v1026_v20, %v1028_v21  ;;  %v189_v35 = vld [vmem:[%s1202_s1 + $0x18] sm:$0xff]  ;;  %v188_v39 = vld [vmem:[%s1202_s1 + $0x10] sm:$0xff]  ;;  %v186_v41 = vld [vmem:[%s1202_s1] sm:$0xff]  ;;  %v145_v59 = vadd.s32 4294967272, %v135_v49  ;;  %vm184_vm5 = vcmask 1041408  }
  0x13   :  { %207 = vmatpush.msra.mxu0 %v189_v35  ;;  %vm191_vm6 = vcmask 261120   ;;  %vm216_vm7 = vcmask 15360  }
  0x15   :  { %208 = vmatpush.msra.mxu0 %v188_v39 }
  0x17   :  { %86 = vadd.xlane.f32.xlu1 %v85_v15  ;;  %209 = vmatpush.msra.mxu0 %v187_v40 }
  0x18   :  { %74 = vadd.xlane.f32.xlu0 %v73_v16 }
  0x19   :  { %89 = vadd.xlane.f32.xlu2 %v88_v17  ;;  %210 = vmatpush.msra.mxu0 %v186_v41 }
  0x1f   :  { %92 = vadd.xlane.f32.xlu1 %v91_v22 }
  0x20   :  { %80 = vadd.xlane.f32.xlu0 %v79_v23 }
  0x21   :  { %103 = vmax.xlane.f32.xlu2 %v102_v24 }
  0x27   :  { %115 = vmax.xlane.f32.xlu1 %v114_v25 }
  0x28   :  { %106 = vmax.xlane.f32.xlu0 %v105_v26 }
  0x29   :  { %118 = vmax.xlane.f32.xlu2 %v117_v27 }
  0x2f   :  { %121 = vmax.xlane.f32.xlu1 %v120_v28 }
  0x30   :  { %109 = vmax.xlane.f32.xlu0 %v108_v29 }
  0x31   :  { %112 = vmax.xlane.f32.xlu2 %v111_v30 }
  0x38   :  { %124 = vmax.xlane.f32.xlu0 %v123_v31 }
  0x82   :  { %v84_v32 = vpop.xlane.xlu1 %83 }
  0x83   :  { %v72_v33 = vpop.xlane.xlu0 %71  ;;  %v98_v50 = vmul.f32 0.00390625, %v84_v32 }
  0x84   :  { %v78_v34 = vpop.xlane.xlu2 %77  ;;  %v94_v54 = vmul.f32 0.00390625, %v72_v33 }
  0x85   :  { %v149_v56 = vperm.slane %v98_v50, %v135_v49  ;;  %v96_v57 = vmul.f32 0.00390625, %v78_v34 }
  0x86   :  { %v136_v7 = vperm.slane %v94_v54, %v135_v49 }
  0x87   :  { %v142_v23 = vperm.slane %v96_v57, %v141_v55 }
  0x8a   :  { %v87_v36 = vpop.xlane.xlu1 %86 }
  0x8b   :  { %v75_v37 = vpop.xlane.xlu0 %74  ;;  %v99_v52 = vmul.f32 0.00390625, %v87_v36 }
  0x8c   :  { %v90_v38 = vpop.xlane.xlu2 %89  ;;  %v95_v53 = vmul.f32 0.00390625, %v75_v37 }
  0x8d   :  { %v100_v58 = vmul.f32 0.00390625, %v90_v38  ;;  %v150_v61 = vperm.slane %v99_v52, %v137_v51  ;;  %v268_v52 = vshrl.u32 %v134_v45, 7 }
  0x8e   :  { %v138_v62 = vperm.slane %v95_v53, %v137_v51 }
  0x8f   :  { %v152_v24 = vperm.slane %v100_v58, %v141_v55  ;;  %v151_v27 = vsel %vm139_vm0, %v150_v61, %v149_v56  ;;  %840 = vset.pattern.permute.xlu0 %v268_v52  ;;  %838 = vset.pattern.permute.xlu1 %v268_v52  ;;  %v275_v53 = vadd.s32 8, %v268_v52 }
  0x90   :  { %v140_v28 = vsel %vm139_vm0, %v138_v62, %v136_v7 }
  0x91   :  { %v153_v35 = vsel %vm143_vm1, %v152_v24, %v151_v27  ;;  %v144_v38 = vsel %vm143_vm1, %v142_v23, %v140_v28  ;;  %839 = vset.pattern.permute.xlu2 %v275_v53  ;;  %v281_v23 = vadd.s32 16, %v268_v52  ;;  %v287_v24 = vadd.s32 24, %v268_v52  ;;  %v461_v27 = vld [vmem:[#allocation6 + $0xf0] sm:$0xff] }
  0x92   :  { %v93_v42 = vpop.xlane.xlu1 %92  ;;  %v493_v28 = vld [vmem:[#allocation6 + $0x1f0] sm:$0xff]  ;;  %561 = vmatpush.msra.mxu2 %v461_v27 }
  0x93   :  { %v81_v43 = vpop.xlane.xlu0 %80  ;;  %v101_v63 = vmul.f32 0.00390625, %v93_v42  ;;  %581 = vmatpush.msra.mxu3 %v493_v28  ;;  %v449_v52 = vld [vmem:[#allocation6 + $0x90] sm:$0xff] }
  0x94   :  { %v104_v44 = vpop.xlane.xlu2 %103  ;;  %v97_v3 = vmul.f32 0.00390625, %v81_v43  ;;  %v481_v53 = vld [vmem:[#allocation6 + $0x190] sm:$0xff] }
  0x95   :  { %v167_v8 = vperm.slane %v104_v44, %v135_v49  ;;  %v154_v29 = vperm.slane %v101_v63, %v145_v59  ;;  %v437_v28 = vld [vmem:[#allocation6 + $0x30] sm:$0xff] }
  0x96   :  { %v146_v30 = vperm.slane %v97_v3, %v145_v59 }
  0x97   :  { %v155_v41 = vsel %vm147_vm2, %v154_v29, %v153_v35  ;;  %v523_v29 = vld [vmem:[#allocation6 + $0x2e0] sm:$0xff]  ;;  %v457_v35 = vld [vmem:[#allocation6 + $0xd0] sm:$0xff] }
  0x98   :  { %v148_v40 = vsel %vm147_vm2, %v146_v30, %v144_v38  ;;  %v555_v30 = vld [vmem:[#allocation6 + $0x3e0] sm:$0xff] }
  0x99   :  { %v551_v38 = vld [vmem:[#allocation6 + $0x3c0] sm:$0xff] }
  0x9a   :  { %v116_v47 = vpop.xlane.xlu1 %115 }
  0x9b   :  { %v107_v46 = vpop.xlane.xlu0 %106  ;;  %v174_v15 = vperm.slane %v116_v47, %v135_v49  ;;  %v190_v49 = vld [vmem:[%s1203_s2] sm:$0x3] }
  0x9c   :  { %v119_v48 = vpop.xlane.xlu2 %118  ;;  %v168_v16 = vperm.slane %v107_v46, %v137_v51  ;;  %v157_v46 = vsel %vm156_vm3, %v155_v41, %v148_v40  ;;  %827 = vmatpush.msk.msra.mxu1 %vm184_vm5, %v190_v49  ;;  %v487_v40 = vld [vmem:[#allocation6 + $0x1c0] sm:$0xff]  ;;  %v517_v41 = vld [vmem:[#allocation6 + $0x2b0] sm:$0xff] }
  0x9d   :  { %v175_v17 = vperm.slane %v119_v48, %v137_v51  ;;  %v483_v49 = vld [vmem:[#allocation6 + $0x1a0] sm:$0xff] }
  0x9e   :  { %v169_v32 = vsel %vm139_vm0, %v168_v16, %v167_v8 }
  0x9f   :  { %v176_v33 = vsel %vm139_vm0, %v175_v17, %v174_v15 }
  0xa2   :  { %v122_v22 = vpop.xlane.xlu1 %121 }
  0xa3   :  { %v110_v60 = vpop.xlane.xlu0 %109  ;;  %v177_v31 = vperm.slane %v122_v22, %v141_v55 }
  0xa4   :  { %v170_v25 = vperm.slane %v110_v60, %v141_v55  ;;  %v113_v26 = vpop.xlane.xlu2 %112 }
  0xa5   :  { %v172_v34 = vperm.slane %v113_v26, %v145_v59  ;;  %v178_v42 = vsel %vm143_vm1, %v177_v31, %v176_v33  ;;  %v557_v26 = vld [vmem:[#allocation6 + $0x3f0] sm:$0xff]  ;;  %v459_v31 = vld [vmem:[#allocation6 + $0xe0] sm:$0xff] }
  0xa6   :  { %v171_v36 = vsel %vm143_vm1, %v170_v25, %v169_v32  ;;  %v525_v25 = vld [vmem:[#allocation6 + $0x2f0] sm:$0xff]  ;;  %621 = vmatpush.msrb.mxu0 %v557_v26  ;;  %v491_v32 = vld [vmem:[#allocation6 + $0x1e0] sm:$0xff]  ;;  %562 = vmatpush.msra.mxu2 %v459_v31 }
  0xa7   :  { %v173_v43 = vsel %vm147_vm2, %v172_v34, %v171_v36  ;;  %601 = vmatpush.msrb.mxu1 %v525_v25  ;;  %v521_v33 = vld [vmem:[#allocation6 + $0x2d0] sm:$0xff]  ;;  %582 = vmatpush.msra.mxu3 %v491_v32  ;;  %v531_v31 = vld [vmem:[#allocation6 + $0x320] sm:$0xff] }
  0xa8   :  { %622 = vmatpush.msrb.mxu0 %v555_v30  ;;  %v553_v34 = vld [vmem:[#allocation6 + $0x3d0] sm:$0xff]  ;;  %563 = vmatpush.msra.mxu2 %v457_v35  ;;  %v499_v30 = vld [vmem:[#allocation6 + $0x220] sm:$0xff] }
  0xa9   :  { %602 = vmatpush.msrb.mxu1 %v523_v29  ;;  %v489_v36 = vld [vmem:[#allocation6 + $0x1d0] sm:$0xff]  ;;  %v435_v32 = vld [vmem:[#allocation6 + $0x20] sm:$0xff] }
  0xaa   :  { %623 = vmatpush.msrb.mxu0 %v553_v34  ;;  %583 = vmatpush.msra.mxu3 %v489_v36  ;;  %v501_v25 = vld [vmem:[#allocation6 + $0x230] sm:$0xff] }
  0xab   :  { %v125_v37 = vpop.xlane.xlu0 %124  ;;  %603 = vmatpush.msrb.mxu1 %v521_v33  ;;  %v533_v26 = vld [vmem:[#allocation6 + $0x330] sm:$0xff]  ;;  %v467_v33 = vld [vmem:[#allocation6 + $0x120] sm:$0xff] }
  0xac   :  { %v179_v39 = vperm.slane %v125_v37, %v145_v59  ;;  %v519_v37 = vld [vmem:[#allocation6 + $0x2c0] sm:$0xff]  ;;  %624 = vmatpush.msrb.mxu0 %v551_v38  ;;  %584 = vmatpush.msra.mxu3 %v487_v40  ;;  %v469_v29 = vld [vmem:[#allocation6 + $0x130] sm:$0xff]  ;;  %v526_v40 = vld [vmem:[#allocation6 + $0x2f8] sm:$0xff] }
  0xad   :  { %604 = vmatpush.msrb.mxu1 %v519_v37  ;;  %v497_v34 = vld [vmem:[#allocation6 + $0x210] sm:$0xff]  ;;  %v495_v38 = vld [vmem:[#allocation6 + $0x200] sm:$0xff] }
  0xae   :  { %v180_v44 = vsel %vm147_vm2, %v179_v39, %v178_v42  ;;  %v455_v39 = vld [vmem:[#allocation6 + $0xc0] sm:$0xff]  ;;  %v549_v42 = vld [vmem:[#allocation6 + $0x3b0] sm:$0xff] }
  0xaf   :  { %v182_v47 = vsel %vm181_vm4, %v180_v44, %v173_v43  ;;  %564 = vmatpush.msra.mxu2 %v455_v39  ;;  %v453_v43 = vld [vmem:[#allocation6 + $0xb0] sm:$0xff]  ;;  %605 = vmatpush.msrb.mxu1 %v517_v41  ;;  %v527_v39 = vld [vmem:[#allocation6 + $0x300] sm:$0xff]  ;;  %v558_v41 = vld [vmem:[#allocation6 + $0x3f8] sm:$0xff] }
  0xb0   :  { %v185_v48 = vsel %vm184_vm5, %v157_v46, %v182_v47  ;;  %v485_v44 = vld [vmem:[#allocation6 + $0x1b0] sm:$0xff]  ;;  %625 = vmatpush.msrb.mxu0 %v549_v42  ;;  %v515_v46 = vld [vmem:[#allocation6 + $0x2a0] sm:$0xff]  ;;  %vm762_vm5 = vcmask 1040384  }
  0xb1   :  { %826 = vmatmul.msk.f32.vlgmr.msra.gmra.mxu0 %vm191_vm6, %v185_v48  ;;  %v547_v47 = vld [vmem:[#allocation6 + $0x3a0] sm:$0xff]  ;;  %565 = vmatpush.msra.mxu2 %v453_v43  ;;  %v529_v35 = vld [vmem:[#allocation6 + $0x310] sm:$0xff] }
  0xb2   :  { %v451_v48 = vld [vmem:[#allocation6 + $0xa0] sm:$0xff]  ;;  %585 = vmatpush.msra.mxu3 %v485_v44  ;;  %606 = vmatpush.msrb.mxu1 %v515_v46  ;;  %v433_v36 = vld [vmem:[#allocation6 + $0x10] sm:$0xff]  ;;  %v462_v44 = vld [vmem:[#allocation6 + $0xf8] sm:$0xff] }
  0xb3   :  { %626 = vmatpush.msrb.mxu0 %v547_v47  ;;  %566 = vmatpush.msra.mxu2 %v451_v48  ;;  %v465_v37 = vld [vmem:[#allocation6 + $0x110] sm:$0xff]  ;;  %v431_v42 = vld [vmem:[#allocation6] sm:$0xff]  ;;  %v494_v46 = vld [vmem:[#allocation6 + $0x1f8] sm:$0xff] }
  0xb4   :  { %586 = vmatpush.msra.mxu3 %v483_v49  ;;  %v463_v43 = vld [vmem:[#allocation6 + $0x100] sm:$0xff]  ;;  %v524_v47 = vld [vmem:[#allocation6 + $0x2e8] sm:$0xff] }
  0xb5   :  { %567 = vmatpush.msra.mxu2 %v449_v52  ;;  %v556_v48 = vld [vmem:[#allocation6 + $0x3e8] sm:$0xff] }
  0xb6   :  { %587 = vmatpush.msra.mxu3 %v481_v53  ;;  %v460_v49 = vld [vmem:[#allocation6 + $0xe8] sm:$0xff]  ;;  %v554_v53 = vld [vmem:[#allocation6 + $0x3d8] sm:$0xff] }
 0x12e   :  { %v212_v50 = vpop.f32.mrf.mxu0 }
 0x12f   :  { %v215_v51 = vmax.f32 %v212_v50, 0.0  ;;  %v513_v50 = vld [vmem:[#allocation6 + $0x290] sm:$0xff] }
 0x130   :  { %607 = vmatpush.msrb.mxu1 %v513_v50  ;;  %v492_v50 = vld [vmem:[#allocation6 + $0x1e8] sm:$0xff] }
 0x131   :  { %828 = vmatmul.msk.f32.vlgmr.msra.gmra.mxu1 %vm216_vm7, %v215_v51  ;;  %v545_v51 = vld [vmem:[#allocation6 + $0x390] sm:$0xff] }
 0x132   :  { %627 = vmatpush.msrb.mxu0 %v545_v51  ;;  %v522_v51 = vld [vmem:[#allocation6 + $0x2d8] sm:$0xff] }
 0x1ae   :  { %v240_v54 = vpop.f32.mrf.mxu1 }
 0x1af   :  { %v244_v55 = vrot.slane %v240_v54, 2 }
 0x1b1   :  { %v246_v56 = vadd.f32 %v244_v55, %v240_v54  ;;  %v511_v54 = vld [vmem:[#allocation6 + $0x280] sm:$0xff] }
 0x1b2   :  { %v543_v55 = vld [vmem:[#allocation6 + $0x380] sm:$0xff]  ;;  %608 = vmatpush.msrb.mxu1 %v511_v54  ;;  %v458_v54 = vld [vmem:[#allocation6 + $0xd8] sm:$0xff] }
 0x1b3   :  { %v829_v57 = vmul.f32 -1.442695, %v246_v56  ;;  %v447_v56 = vld [vmem:[#allocation6 + $0x80] sm:$0xff]  ;;  %628 = vmatpush.msrb.mxu0 %v543_v55  ;;  %v490_v55 = vld [vmem:[#allocation6 + $0x1d8] sm:$0xff] }
 0x1b4   :  { %568 = vmatpush.msra.mxu2 %v447_v56  ;;  %v520_v56 = vld [vmem:[#allocation6 + $0x2c8] sm:$0xff] }
 0x1b5   :  { %846 = vpow2.f32 %v829_v57  ;;  %v479_v57 = vld [vmem:[#allocation6 + $0x180] sm:$0xff] }
 0x1b6   :  { %588 = vmatpush.msra.mxu3 %v479_v57  ;;  %v552_v57 = vld [vmem:[#allocation6 + $0x3c8] sm:$0xff] }
 0x1bb   :  { %v847_v58 = vpop.eup %846 }
 0x1bc   :  { %v250_v59 = vadd.f32 1.0, %v847_v58  ;;  %v509_v58 = vld [vmem:[#allocation6 + $0x270] sm:$0xff] }
 0x1bd   :  { %609 = vmatpush.msrb.mxu1 %v509_v58  ;;  %v456_v58 = vld [vmem:[#allocation6 + $0xc8] sm:$0xff] }
 0x1be   :  { %848 = vrcp.f32 %v250_v59  ;;  %v262_v63 = vand.u32 2147483648, %v250_v59  ;;  %v260_v7 = vand.u32 2147483647, %v250_v59  ;;  %vm256_vm9 = vweird.f32 %v250_v59 }
 0x1c0   :  { %v263_v8 = vor.u32 1.1754944e-38, %v262_v63  ;;  %vm261_vm11 = vcmp.eq.f32.partialorder %v260_v7, 8.507059e+37  ;;  %v539_v63 = vld [vmem:[#allocation6 + $0x360] sm:$0xff] }
 0x1c1   :  { %v475_v7 = vld [vmem:[#allocation6 + $0x160] sm:$0xff] }
 0x1c4   :  { %v849_v60 = vpop.eup %848 }
 0x1c5   :  { %v252_v61 = vmul.f32 %v849_v60, %v250_v59  ;;  %vm257_vm8 = vweird.f32 %v849_v60  ;;  %v541_v59 = vld [vmem:[#allocation6 + $0x370] sm:$0xff] }
 0x1c6   :  { %vm258_vm10 = vmor %vm256_vm9, %vm257_vm8  ;;  %629 = vmatpush.msrb.mxu0 %v541_v59  ;;  %v488_v59 = vld [vmem:[#allocation6 + $0x1c8] sm:$0xff] }
 0x1c7   :  { %v253_v62 = vsub.f32 1.0, %v252_v61  ;;  %v477_v61 = vld [vmem:[#allocation6 + $0x170] sm:$0xff] }
 0x1c8   :  { %589 = vmatpush.msra.mxu3 %v477_v61  ;;  %630 = vmatpush.msrb.mxu0 %v539_v63  ;;  %v550_v61 = vld [vmem:[#allocation6 + $0x3b8] sm:$0xff] }
 0x1c9   :  { %v254_v3 = vmul.f32 %v849_v60, %v253_v62  ;;  %v507_v62 = vld [vmem:[#allocation6 + $0x260] sm:$0xff]  ;;  %v486_v63 = vld [vmem:[#allocation6 + $0x1b8] sm:$0xff] }
 0x1ca   :  { %610 = vmatpush.msrb.mxu1 %v507_v62  ;;  %590 = vmatpush.msra.mxu3 %v475_v7  ;;  %v454_v62 = vld [vmem:[#allocation6 + $0xb8] sm:$0xff]  ;;  %v548_v7 = vld [vmem:[#allocation6 + $0x3a8] sm:$0xff] }
 0x1cb   :  { %v255_v45 = vadd.f32 %v849_v60, %v254_v3  ;;  %v443_v3 = vld [vmem:[#allocation6 + $0x60] sm:$0xff] }
 0x1cd   :  { %v259_v15 = vsel %vm258_vm10, %v849_v60, %v255_v45  ;;  %v445_v60 = vld [vmem:[#allocation6 + $0x70] sm:$0xff] }
 0x1ce   :  { %v264_v16 = vsel %vm261_vm11, %v263_v8, %v259_v15  ;;  %569 = vmatpush.msra.mxu2 %v445_v60  ;;  %v505_v45 = vld [vmem:[#allocation6 + $0x250] sm:$0xff]  ;;  %v518_v60 = vld [vmem:[#allocation6 + $0x2b8] sm:$0xff] }
 0x1cf   :  { %v291_v17 = vperm.slane %v264_v16, 1  ;;  %v266_v22 = vperm.slane %v264_v16, 0  ;;  %v537_v8 = vld [vmem:[#allocation6 + $0x350] sm:$0xff]  ;;  %611 = vmatpush.msrb.mxu1 %v505_v45 }
 0x1d0   :  { %570 = vmatpush.msra.mxu2 %v443_v3  ;;  %631 = vmatpush.msrb.mxu0 %v537_v8  ;;  %v441_v15 = vld [vmem:[#allocation6 + $0x50] sm:$0xff]  ;;  %v516_v3 = vld [vmem:[#allocation6 + $0x2a8] sm:$0xff] }
 0x1d1   :  { %296 = vperm.xlu0 %840, %v291_v17   ;;  %277 = vperm.xlu2 %839, %v266_v22   ;;  %v473_v16 = vld [vmem:[#allocation6 + $0x150] sm:$0xff] }
 0x1d2   :  { %271 = vperm.xlu1 %838, %v266_v22   ;;  %571 = vmatpush.msra.mxu2 %v441_v15  ;;  %v452_v15 = vld [vmem:[#allocation6 + $0xa8] sm:$0xff] }
 0x1d3   :  { %591 = vmatpush.msra.mxu3 %v473_v16  ;;  %v484_v16 = vld [vmem:[#allocation6 + $0x1a8] sm:$0xff] }
 0x1d9   :  { %302 = vperm.xlu2 %839, %v291_v17   ;;  %845 = vset.pattern.permute.xlu0 %v287_v24 }
 0x1da   :  { %841 = vset.pattern.permute.xlu1 %v281_v23 }
 0x1e1   :  { %842 = vset.pattern.permute.xlu2 %v281_v23  ;;  %v439_v23 = vld [vmem:[#allocation6 + $0x40] sm:$0xff] }
 0x1e2   :  { %283 = vperm.xlu1 %841, %v266_v22   ;;  %572 = vmatpush.msra.mxu2 %v439_v23  ;;  %v450_v23 = vld [vmem:[#allocation6 + $0x98] sm:$0xff] }
 0x1e4   :  { %573 = vmatpush.msra.mxu2 %v437_v28  ;;  %v512_v28 = vld [vmem:[#allocation6 + $0x288] sm:$0xff] }
 0x1e6   :  { %574 = vmatpush.msra.mxu2 %v435_v32 }
 0x1e8   :  { %575 = vmatpush.msra.mxu2 %v433_v36 }
 0x1e9   :  { %308 = vperm.xlu2 %842, %v291_v17  }
 0x1ea   :  { %843 = vset.pattern.permute.xlu1 %v287_v24  ;;  %576 = vmatpush.msra.mxu2 %v431_v42  ;;  %v444_v42 = vld [vmem:[#allocation6 + $0x68] sm:$0xff] }
 0x1ec   :  { %641 = vmatpush.msrb.mxu2 %v462_v44 }
 0x1ee   :  { %642 = vmatpush.msrb.mxu2 %v460_v49 }
 0x1f0   :  { %643 = vmatpush.msrb.mxu2 %v458_v54 }
 0x1f1   :  { %844 = vset.pattern.permute.xlu2 %v287_v24  ;;  %v471_v24 = vld [vmem:[#allocation6 + $0x140] sm:$0xff] }
 0x1f2   :  { %289 = vperm.xlu1 %843, %v266_v22   ;;  %v535_v22 = vld [vmem:[#allocation6 + $0x340] sm:$0xff]  ;;  %592 = vmatpush.msra.mxu3 %v471_v24  ;;  %v482_v24 = vld [vmem:[#allocation6 + $0x198] sm:$0xff] }
 0x1f3   :  { %632 = vmatpush.msrb.mxu0 %v535_v22  ;;  %644 = vmatpush.msrb.mxu2 %v456_v58  ;;  %v546_v22 = vld [vmem:[#allocation6 + $0x398] sm:$0xff]  ;;  %v440_v58 = vld [vmem:[#allocation6 + $0x48] sm:$0xff] }
 0x1f4   :  { %593 = vmatpush.msra.mxu3 %v469_v29  ;;  %v544_v29 = vld [vmem:[#allocation6 + $0x388] sm:$0xff] }
 0x1f5   :  { %633 = vmatpush.msrb.mxu0 %v533_v26  ;;  %645 = vmatpush.msrb.mxu2 %v454_v62 }
 0x1f6   :  { %594 = vmatpush.msra.mxu3 %v467_v33 }
 0x1f7   :  { %634 = vmatpush.msrb.mxu0 %v531_v31  ;;  %646 = vmatpush.msrb.mxu2 %v452_v15  ;;  %v480_v31 = vld [vmem:[#allocation6 + $0x188] sm:$0xff] }
 0x1f8   :  { %595 = vmatpush.msra.mxu3 %v465_v37 }
 0x1f9   :  { %314 = vperm.xlu2 %844, %v291_v17   ;;  %v503_v17 = vld [vmem:[#allocation6 + $0x240] sm:$0xff]  ;;  %635 = vmatpush.msrb.mxu0 %v529_v35  ;;  %v478_v35 = vld [vmem:[#allocation6 + $0x178] sm:$0xff] }
 0x1fa   :  { %612 = vmatpush.msrb.mxu1 %v503_v17  ;;  %596 = vmatpush.msra.mxu3 %v463_v43  ;;  %v514_v17 = vld [vmem:[#allocation6 + $0x298] sm:$0xff] }
 0x1fb   :  { %636 = vmatpush.msrb.mxu0 %v527_v39  ;;  %647 = vmatpush.msrb.mxu2 %v450_v23  ;;  %v436_v23 = vld [vmem:[#allocation6 + $0x28] sm:$0xff] }
 0x1fc   :  { %613 = vmatpush.msrb.mxu1 %v501_v25  ;;  %661 = vmatpush.msrb.mxu3 %v494_v46 }
 0x1fd   :  { %701 = vmatpush.msra.mxu0 %v558_v41 }
 0x1fe   :  { %614 = vmatpush.msrb.mxu1 %v499_v30  ;;  %662 = vmatpush.msrb.mxu3 %v492_v50  ;;  %v448_v30 = vld [vmem:[#allocation6 + $0x88] sm:$0xff] }
 0x1ff   :  { %702 = vmatpush.msra.mxu0 %v556_v48  ;;  %648 = vmatpush.msrb.mxu2 %v448_v30  ;;  %v538_v48 = vld [vmem:[#allocation6 + $0x358] sm:$0xff] }
 0x200   :  { %615 = vmatpush.msrb.mxu1 %v497_v34  ;;  %663 = vmatpush.msrb.mxu3 %v490_v55  ;;  %v542_v34 = vld [vmem:[#allocation6 + $0x378] sm:$0xff] }
 0x201   :  { %703 = vmatpush.msra.mxu0 %v554_v53  ;;  %v942_v53 = vmov 32.0  }
 0x202   :  { %616 = vmatpush.msrb.mxu1 %v495_v38  ;;  %664 = vmatpush.msrb.mxu3 %v488_v59  ;;  %v540_v38 = vld [vmem:[#allocation6 + $0x368] sm:$0xff]  ;;  %850 = vrcp.f32 %v942_v53 }
 0x203   :  { %704 = vmatpush.msra.mxu0 %v552_v57  ;;  %v536_v57 = vld [vmem:[#allocation6 + $0x348] sm:$0xff] }
 0x204   :  { %681 = vmatpush.msra.mxu1 %v526_v40  ;;  %665 = vmatpush.msrb.mxu3 %v486_v63  ;;  %v472_v59 = vld [vmem:[#allocation6 + $0x148] sm:$0xff]  ;;  %v534_v63 = vld [vmem:[#allocation6 + $0x338] sm:$0xff] }
 0x205   :  { %705 = vmatpush.msra.mxu0 %v550_v61 }
 0x206   :  { %682 = vmatpush.msra.mxu1 %v524_v47  ;;  %666 = vmatpush.msrb.mxu3 %v484_v16 }
 0x207   :  { %706 = vmatpush.msra.mxu0 %v548_v7  ;;  %v470_v7 = vld [vmem:[#allocation6 + $0x138] sm:$0xff] }
 0x208   :  { %683 = vmatpush.msra.mxu1 %v522_v51  ;;  %667 = vmatpush.msrb.mxu3 %v482_v24  ;;  %v442_v51 = vld [vmem:[#allocation6 + $0x58] sm:$0xff]  ;;  %v468_v24 = vld [vmem:[#allocation6 + $0x128] sm:$0xff] }
 0x209   :  { %707 = vmatpush.msra.mxu0 %v546_v22  ;;  %v532_v22 = vld [vmem:[#allocation6 + $0x328] sm:$0xff] }
 0x20a   :  { %684 = vmatpush.msra.mxu1 %v520_v56  ;;  %668 = vmatpush.msrb.mxu3 %v480_v31 }
 0x20b   :  { %708 = vmatpush.msra.mxu0 %v544_v29 }
 0x20c   :  { %685 = vmatpush.msra.mxu1 %v518_v60  ;;  %669 = vmatpush.msrb.mxu3 %v478_v35  ;;  %v502_v60 = vld [vmem:[#allocation6 + $0x238] sm:$0xff] }
 0x20d   :  { %709 = vmatpush.msra.mxu0 %v542_v34  ;;  %v530_v34 = vld [vmem:[#allocation6 + $0x318] sm:$0xff] }
 0x20e   :  { %686 = vmatpush.msra.mxu1 %v516_v3  ;;  %v438_v3 = vld [vmem:[#allocation6 + $0x38] sm:$0xff] }
 0x20f   :  { %710 = vmatpush.msra.mxu0 %v540_v38 }
 0x210   :  { %687 = vmatpush.msra.mxu1 %v514_v17  ;;  %v500_v17 = vld [vmem:[#allocation6 + $0x228] sm:$0xff] }
 0x211   :  { %711 = vmatpush.msra.mxu0 %v538_v48 }
 0x212   :  { %688 = vmatpush.msra.mxu1 %v512_v28 }
 0x213   :  { %712 = vmatpush.msra.mxu0 %v536_v57 }
 0x215   :  { %713 = vmatpush.msra.mxu0 %v534_v63 }
 0x217   :  { %714 = vmatpush.msra.mxu0 %v532_v22 }
 0x219   :  { %715 = vmatpush.msra.mxu0 %v530_v34 }
 0x22b   :  { %v1080_v27 = vpop.permute.xlu2 %277 }
 0x22c   :  { %v1136_v35 = vmul.f32 %v1080_v27, %v1010_v12  ;;  %v528_v12 = vld [vmem:[#allocation6 + $0x308] sm:$0xff] }
 0x22d   :  { %716 = vmatpush.msra.mxu0 %v528_v12 }
 0x233   :  { %v303_v52 = vpop.permute.xlu2 %302 }
 0x234   :  { %v1089_v32 = vmul.f32 %v303_v52, %v1004_v9  ;;  %v1092_v33 = vmul.f32 %v303_v52, %v1006_v10  ;;  %v508_v9 = vld [vmem:[#allocation6 + $0x268] sm:$0xff]  ;;  %v474_v52 = vld [vmem:[#allocation6 + $0x158] sm:$0xff] }
 0x243   :  { %v297_v45 = vpop.permute.xlu0 %296  ;;  %v309_v8 = vpop.permute.xlu2 %308 }
 0x244   :  { %v1083_v25 = vmul.f32 %v297_v45, %v986_v0  ;;  %v1086_v26 = vmul.f32 %v297_v45, %v988_v1  ;;  %v510_v0 = vld [vmem:[#allocation6 + $0x278] sm:$0xff]  ;;  %v1101_v39 = vmul.f32 %v309_v8, %v1012_v13  ;;  %v1104_v40 = vmul.f32 %v309_v8, %v1014_v14  ;;  %v272_v44 = vpop.permute.xlu1 %271  ;;  %v476_v13 = vld [vmem:[#allocation6 + $0x168] sm:$0xff]  ;;  %v1122_v45 = vpop.eup %850 }
 0x245   :  { %v446_v1 = vld [vmem:[#allocation6 + $0x78] sm:$0xff]  ;;  %689 = vmatpush.msra.mxu1 %v510_v0  ;;  %670 = vmatpush.msrb.mxu3 %v476_v13  ;;  %v1125_v28 = vmul.f32 %v272_v44, %v990_v2  ;;  %v1128_v29 = vmul.f32 %v272_v44, %v994_v4  ;;  %v369_v2 = vmul.f32 32.0, %v1122_v45  ;;  %v464_v44 = vld [vmem:[#allocation6 + $0x108] sm:$0xff]  ;;  %vm373_vm12 = vweird.f32 %v1122_v45 }
 0x246   :  { %v350_v36 = vadd.f32 %v1089_v32, %v1083_v25  ;;  %v359_v37 = vadd.f32 %v1092_v33, %v1086_v26  ;;  %v397_v10 = vmax.f32 %v1083_v25, %v1089_v32  ;;  %v406_v43 = vmax.f32 %v1086_v26, %v1092_v33  ;;  %649 = vmatpush.msrb.mxu2 %v446_v1  ;;  %v506_v14 = vld [vmem:[#allocation6 + $0x258] sm:$0xff] }
 0x247   :  { %690 = vmatpush.msra.mxu1 %v508_v9  ;;  %671 = vmatpush.msrb.mxu3 %v474_v52  ;;  %v498_v0 = vld [vmem:[#allocation6 + $0x218] sm:$0xff]  ;;  %v1132_v1 = vmul.f32 %v1080_v27, %v1008_v11  ;;  %v432_v27 = vld [vmem:[#allocation6 + $0x8] sm:$0xff]  ;;  %v388_v13 = vmax.f32 %v1128_v29, %v1136_v35 }
 0x248   :  { %v351_v49 = vadd.f32 %v350_v36, %v1101_v39  ;;  %v360_v50 = vadd.f32 %v359_v37, %v1104_v40  ;;  %650 = vmatpush.msrb.mxu2 %v444_v42  ;;  %v407_v54 = vmax.f32 %v406_v43, %v1104_v40  ;;  %v434_v4 = vld [vmem:[#allocation6 + $0x18] sm:$0xff] }
 0x249   :  { %691 = vmatpush.msra.mxu1 %v506_v14  ;;  %672 = vmatpush.msrb.mxu3 %v472_v59  ;;  %v466_v11 = vld [vmem:[#allocation6 + $0x118] sm:$0xff]  ;;  %v370_v14 = vsub.f32 1.0, %v369_v2 }
 0x24a   :  { %651 = vmatpush.msrb.mxu2 %v442_v51 }
 0x24b   :  { %673 = vmatpush.msrb.mxu3 %v470_v7 }
 0x24c   :  { %652 = vmatpush.msrb.mxu2 %v440_v58 }
 0x24d   :  { %674 = vmatpush.msrb.mxu3 %v468_v24 }
 0x24e   :  { %653 = vmatpush.msrb.mxu2 %v438_v3 }
 0x24f   :  { %675 = vmatpush.msrb.mxu3 %v466_v11 }
 0x250   :  { %654 = vmatpush.msrb.mxu2 %v436_v23 }
 0x251   :  { %676 = vmatpush.msrb.mxu3 %v464_v44 }
 0x252   :  { %655 = vmatpush.msrb.mxu2 %v434_v4 }
 0x253   :  { %v315_v41 = vpop.permute.xlu2 %314 }
 0x254   :  { %v1109_v46 = vmul.f32 %v315_v41, %v1022_v18  ;;  %v1112_v47 = vmul.f32 %v315_v41, %v1024_v19  ;;  %v398_v18 = vmax.f32 %v397_v10, %v1101_v39  ;;  %v504_v19 = vld [vmem:[#allocation6 + $0x248] sm:$0xff]  ;;  %v284_v16 = vpop.permute.xlu1 %283  ;;  %v341_v41 = vadd.f32 %v1136_v35, %v1128_v29  ;;  %656 = vmatpush.msrb.mxu2 %v432_v27 }
 0x255   :  { %692 = vmatpush.msra.mxu1 %v504_v19  ;;  %v1139_v36 = vmul.f32 %v284_v16, %v996_v5  ;;  %v1143_v38 = vmul.f32 %v284_v16, %v998_v6  ;;  %v496_v10 = vld [vmem:[#allocation6 + $0x208] sm:$0xff]  ;;  %v332_v5 = vadd.f32 %v1132_v1, %v1125_v28  ;;  %v379_v6 = vmax.f32 %v1125_v28, %v1132_v1 }
 0x256   :  { %v352_v55 = vadd.f32 %v351_v49, %v1109_v46  ;;  %v361_v56 = vadd.f32 %v360_v50, %v1112_v47  ;;  %v399_v61 = vmax.f32 %v398_v18, %v1109_v46  ;;  %v408_v62 = vmax.f32 %v407_v54, %v1112_v47 }
 0x257   :  { %693 = vmatpush.msra.mxu1 %v502_v60  ;;  %v333_v50 = vadd.f32 %v332_v5, %v1139_v36  ;;  %v342_v51 = vadd.f32 %v341_v41, %v1143_v38  ;;  %v380_v53 = vmax.f32 %v379_v6, %v1139_v36  ;;  %v389_v18 = vmax.f32 %v388_v13, %v1143_v38 }
 0x258   :  { %v353_v8 = vrot.slane %v352_v55, 4  ;;  %v362_v15 = vrot.slane %v361_v56, 4  ;;  %v400_v30 = vrot.slane %v399_v61, 4  ;;  %v409_v31 = vrot.slane %v408_v62, 4 }
 0x259   :  { %694 = vmatpush.msra.mxu1 %v500_v17 }
 0x25a   :  { %v354_v37 = vadd.f32 %v353_v8, %v352_v55  ;;  %v363_v9 = vadd.f32 %v362_v15, %v361_v56  ;;  %v401_v42 = vmax.f32 %v399_v61, %v400_v30  ;;  %v410_v43 = vmax.f32 %v408_v62, %v409_v31 }
 0x25b   :  { %695 = vmatpush.msra.mxu1 %v498_v0  ;;  %v371_v62 = vmul.f32 %v1122_v45, %v370_v14 }
 0x25c   :  { %v355_v48 = vrot.slane %v354_v37, 2  ;;  %v364_v49 = vrot.slane %v363_v9, 2  ;;  %v402_v55 = vrot.slane %v401_v42, 2  ;;  %v411_v56 = vrot.slane %v410_v43, 2 }
 0x25d   :  { %696 = vmatpush.msra.mxu1 %v496_v10  ;;  %v372_v30 = vadd.f32 %v1122_v45, %v371_v62 }
 0x25e   :  { %v356_v61 = vadd.f32 %v355_v48, %v354_v37  ;;  %v365_v63 = vadd.f32 %v364_v49, %v363_v9  ;;  %v403_v8 = vmax.f32 %v401_v42, %v402_v55  ;;  %v412_v15 = vmax.f32 %v410_v43, %v411_v56 }
 0x25f   :  { %v374_v41 = vsel %vm373_vm12, %v1122_v45, %v372_v30 }
 0x260   :  { %v357_v24 = vrot.slane %v356_v61, 1  ;;  %v366_v31 = vrot.slane %v365_v63, 1  ;;  %v404_v37 = vrot.slane %v403_v8, 1  ;;  %v413_v9 = vrot.slane %v412_v15, 1 }
 0x262   :  { %v358_v5 = vadd.f32 %v357_v24, %v356_v61  ;;  %v367_v42 = vadd.f32 %v366_v31, %v365_v63  ;;  %v405_v14 = vmax.f32 %v403_v8, %v404_v37  ;;  %v414_v48 = vmax.f32 %v412_v15, %v413_v9 }
 0x264   :  { %v290_v52 = vpop.permute.xlu1 %289 }
 0x265   :  { %v1158_v19 = vmul.f32 %v290_v52, %v1026_v20  ;;  %v1161_v54 = vmul.f32 %v290_v52, %v1028_v21 }
 0x267   :  { %v334_v57 = vadd.f32 %v333_v50, %v1158_v19  ;;  %v343_v58 = vadd.f32 %v342_v51, %v1161_v54  ;;  %v381_v59 = vmax.f32 %v380_v53, %v1158_v19  ;;  %v390_v60 = vmax.f32 %v389_v18, %v1161_v54 }
 0x268   :  { %v377_v53 = vmul.f32 %v374_v41, %v358_v5  ;;  %v378_v18 = vmul.f32 %v374_v41, %v367_v42 }
 0x269   :  { %v335_v20 = vrot.slane %v334_v57, 4  ;;  %v344_v3 = vrot.slane %v343_v58, 4  ;;  %v382_v7 = vrot.slane %v381_v59, 4  ;;  %v391_v21 = vrot.slane %v390_v60, 4 }
 0x26b   :  { %v336_v16 = vadd.f32 %v335_v20, %v334_v57  ;;  %v345_v17 = vadd.f32 %v344_v3, %v343_v58  ;;  %v383_v22 = vmax.f32 %v381_v59, %v382_v7  ;;  %v392_v23 = vmax.f32 %v390_v60, %v391_v21 }
 0x26c   :  { %v560_v60 = vstv %s1205_s4  ;;  %s943_s4 = smov [#allocation8]  }
 0x26d   :  { %v337_v0 = vrot.slane %v336_v16, 2  ;;  %v346_v34 = vrot.slane %v345_v17, 2  ;;  %v384_v2 = vrot.slane %v383_v22, 2  ;;  %v393_v4 = vrot.slane %v392_v23, 2  ;;  %s810_s13 = sshll.u32 %s943_s4, 4  ;;  %s811_s13 = int_to_ptr.vmem [resolvable:$true] %s810_s13 }
 0x26f   :  { %v385_v11 = vmax.f32 %v383_v22, %v384_v2  ;;  %v394_v10 = vmax.f32 %v392_v23, %v393_v4  ;;  %v338_v12 = vadd.f32 %v337_v0, %v336_v16  ;;  %v347_v27 = vadd.f32 %v346_v34, %v345_v17 }
 0x271   :  { %v386_v43 = vrot.slane %v385_v11, 1  ;;  %v395_v44 = vrot.slane %v394_v10, 1  ;;  %v339_v6 = vrot.slane %v338_v12, 1  ;;  %v348_v13 = vrot.slane %v347_v27, 1 }
 0x273   :  { %v387_v49 = vmax.f32 %v385_v11, %v386_v43  ;;  %v396_v50 = vmax.f32 %v394_v10, %v395_v44  ;;  %v340_v51 = vadd.f32 %v339_v6, %v338_v12  ;;  %v349_v52 = vadd.f32 %v348_v13, %v347_v27 }
 0x275   :  { %v427_v55 = vsel %vm156_vm3, %v405_v14, %v387_v49  ;;  %v428_v56 = vsel %vm156_vm3, %v414_v48, %v396_v50  ;;  %v375_v57 = vmul.f32 %v374_v41, %v340_v51  ;;  %v376_v58 = vmul.f32 %v374_v41, %v349_v52 }
 0x276   :  { %617 = vmatmul.f32.vlgmr.msrb.gmra.mxu1 %v427_v55  ;;  %637 = vmatmul.f32.vlgmr.msrb.gmra.mxu0 %v428_v56 }
 0x277   :  { %v419_v45 = vsel %vm156_vm3, %v377_v53, %v375_v57  ;;  %v420_v59 = vsel %vm156_vm3, %v378_v18, %v376_v58 }
 0x278   :  { %577 = vmatmul.f32.vlgmr.msra.gmra.mxu2 %v419_v45  ;;  %597 = vmatmul.f32.vlgmr.msra.gmra.mxu3 %v420_v59 }
 0x27e   :  { %697 = vmatmul.f32.vlgmr.msra.gmra.mxu1 %v427_v55  ;;  %717 = vmatmul.f32.vlgmr.msra.gmra.mxu0 %v428_v56 }
 0x280   :  { %657 = vmatmul.f32.vlgmr.msrb.gmra.mxu2 %v419_v45  ;;  %677 = vmatmul.f32.vlgmr.msrb.gmra.mxu3 %v420_v59 }
 0x2f3   :  { %v618_v20 = vpop.f32.mrf.mxu1  ;;  %v638_v7 = vpop.f32.mrf.mxu0 }
 0x2fb   :  { %v578_v61 = vpop.f32.mrf.mxu2  ;;  %v598_v62 = vpop.f32.mrf.mxu3 }
 0x2fc   :  { %v579_v63 = vadd.f32 %v578_v61, %v560_v60  ;;  %v698_v24 = vpop.f32.mrf.mxu1  ;;  %v718_v31 = vpop.f32.mrf.mxu0 }
 0x2fe   :  { %v599_v3 = vadd.f32 %v598_v62, %v579_v63 }
 0x300   :  { %v619_v21 = vadd.f32 %v618_v20, %v599_v3 }
 0x302   :  { %v639_v8 = vadd.f32 %v638_v7, %v619_v21 }
 0x303   :  { %v658_v15 = vpop.f32.mrf.mxu2  ;;  %v678_v22 = vpop.f32.mrf.mxu3 }
 0x304   :  { %v830_v16 = vmul.f32 -1.442695, %v639_v8  ;;  %v659_v17 = vadd.f32 %v658_v15, %v560_v60 }
 0x306   :  { %852 = vpow2.f32 %v830_v16  ;;  %v679_v23 = vadd.f32 %v678_v22, %v659_v17 }
 0x308   :  { %v699_v30 = vadd.f32 %v698_v24, %v679_v23 }
 0x30a   :  { %v719_v0 = vadd.f32 %v718_v31, %v699_v30 }
 0x30c   :  { %v853_v34 = vpop.eup %852  ;;  %v831_v2 = vmul.f32 -1.442695, %v719_v0 }
 0x30d   :  { %v727_v4 = vadd.f32 1.0, %v853_v34 }
 0x30e   :  { %854 = vpow2.f32 %v831_v2 }
 0x30f   :  { %856 = vrcp.f32 %v727_v4  ;;  %vm734_vm15 = vweird.f32 %v727_v4  ;;  %v740_v14 = vand.u32 2147483648, %v727_v4  ;;  %v738_v48 = vand.u32 2147483647, %v727_v4 }
 0x311   :  { %v741_v53 = vor.u32 1.1754944e-38, %v740_v14  ;;  %vm739_vm6 = vcmp.eq.f32.partialorder %v738_v48, 8.507059e+37 }
 0x314   :  { %v855_v37 = vpop.eup %854 }
 0x315   :  { %v857_v9 = vpop.eup %856  ;;  %v728_v11 = vadd.f32 1.0, %v855_v37 }
 0x316   :  { %v730_v10 = vmul.f32 %v857_v9, %v727_v4  ;;  %vm735_vm13 = vweird.f32 %v857_v9 }
 0x317   :  { %858 = vrcp.f32 %v728_v11  ;;  %v755_v43 = vand.u32 2147483648, %v728_v11  ;;  %v753_v13 = vand.u32 2147483647, %v728_v11  ;;  %vm736_vm0 = vmor %vm734_vm15, %vm735_vm13  ;;  %vm749_vm1 = vweird.f32 %v728_v11 }
 0x318   :  { %v731_v12 = vsub.f32 1.0, %v730_v10 }
 0x319   :  { %v756_v50 = vor.u32 1.1754944e-38, %v755_v43  ;;  %vm754_vm4 = vcmp.eq.f32.partialorder %v753_v13, 8.507059e+37 }
 0x31a   :  { %v732_v5 = vmul.f32 %v857_v9, %v731_v12 }
 0x31c   :  { %v733_v44 = vadd.f32 %v857_v9, %v732_v5 }
 0x31d   :  { %v859_v27 = vpop.eup %858 }
 0x31e   :  { %v745_v41 = vmul.f32 %v859_v27, %v728_v11  ;;  %vm750_vm14 = vweird.f32 %v859_v27  ;;  %v737_v51 = vsel %vm736_vm0, %v857_v9, %v733_v44 }
 0x31f   :  { %vm751_vm2 = vmor %vm749_vm1, %vm750_vm14  ;;  %v742_v56 = vsel %vm739_vm6, %v741_v53, %v737_v51 }
 0x320   :  { %v746_v42 = vsub.f32 1.0, %v745_v41 }
 0x322   :  { %v747_v6 = vmul.f32 %v859_v27, %v746_v42 }
 0x324   :  { %v748_v49 = vadd.f32 %v859_v27, %v747_v6 }
 0x326   :  { %v752_v52 = vsel %vm751_vm2, %v859_v27, %v748_v49 }
 0x327   :  { %v757_v18 = vsel %vm754_vm4, %v756_v50, %v752_v52 }
 0x328   :  { %v761_v55 = vrot.slane %v757_v18, 7 }
 0x32a   :  { %v763_v57 = vsel %vm762_vm5, %v742_v56, %v761_v55  ;;  %v764_v58 = vsel %vm156_vm3, %v742_v56, %v761_v55 }
 0x32b   :  { %v765_v45 = vrot.slane %v764_v58, 1  ;;  %v766_v59 = vperm.slane %v763_v57, 0  ;;  %v767_v60 = vperm.slane %v763_v57, 1 }
 0x32d   :  { %v774_v61 = vmul.f32 %v766_v59, %v1125_v28  ;;  %v775_v62 = vmul.f32 %v767_v60, %v1128_v29  ;;  %v776_v63 = vmul.f32 %v766_v59, %v1132_v1  ;;  %v777_v20 = vmul.f32 %v767_v60, %v1136_v35 }
 0x32e   :  { %v768_v3 = vperm.slane %v765_v45, 0  ;;  %v778_v7 = vmul.f32 %v766_v59, %v1139_v36  ;;  %v769_v21 = vperm.slane %v765_v45, 1  ;;  %v779_v8 = vmul.f32 %v767_v60, %v1143_v38 }
 0x32f   :  { %790 = vst [vmem:[#allocation8] sm:$0xff] %v774_v61  ;;  %v780_v15 = vmul.f32 %v766_v59, %v1158_v19  ;;  %v781_v16 = vmul.f32 %v767_v60, %v1161_v54 }
 0x330   :  { %791 = vst [vmem:[#allocation8 + $0x8] sm:$0xff] %v775_v62  ;;  %v782_v28 = vmul.f32 %v768_v3, %v1083_v25  ;;  %v783_v29 = vmul.f32 %v769_v21, %v1086_v26  ;;  %v784_v1 = vmul.f32 %v768_v3, %v1089_v32  ;;  %v785_v35 = vmul.f32 %v769_v21, %v1092_v33 }
 0x331   :  { %792 = vst [vmem:[#allocation8 + $0x10] sm:$0xff] %v776_v63  ;;  %v786_v36 = vmul.f32 %v768_v3, %v1101_v39  ;;  %v787_v38 = vmul.f32 %v769_v21, %v1104_v40  ;;  %v788_v19 = vmul.f32 %v768_v3, %v1109_v46  ;;  %v789_v25 = vmul.f32 %v769_v21, %v1112_v47 }
 0x332   :  { %793 = vst [vmem:[#allocation8 + $0x18] sm:$0xff] %v777_v20 }
 0x333   :  { %794 = vst [vmem:[#allocation8 + $0x20] sm:$0xff] %v778_v7 }
 0x334   :  { %795 = vst [vmem:[#allocation8 + $0x28] sm:$0xff] %v779_v8 }
 0x335   :  { %796 = vst [vmem:[#allocation8 + $0x30] sm:$0xff] %v780_v15 }
 0x336   :  { %797 = vst [vmem:[#allocation8 + $0x38] sm:$0xff] %v781_v16 }
 0x337   :  { %798 = vst [vmem:[#allocation8 + $0x40] sm:$0xff] %v782_v28 }
 0x338   :  { %799 = vst [vmem:[#allocation8 + $0x48] sm:$0xff] %v783_v29 }
 0x339   :  { %800 = vst [vmem:[#allocation8 + $0x50] sm:$0xff] %v784_v1 }
 0x33a   :  { %801 = vst [vmem:[#allocation8 + $0x58] sm:$0xff] %v785_v35 }
 0x33b   :  { %802 = vst [vmem:[#allocation8 + $0x60] sm:$0xff] %v786_v36 }
 0x33c   :  { %803 = vst [vmem:[#allocation8 + $0x68] sm:$0xff] %v787_v38 }
 0x33d   :  { %804 = vst [vmem:[#allocation8 + $0x70] sm:$0xff] %v788_v19 }
 0x33e   :  { %805 = vst [vmem:[#allocation8 + $0x78] sm:$0xff] %v789_v25 }
 0x33f   :  { %818 = dma.vmem_to_hbm [thread:$0]  %s811_s13, 2048, %s813_s16, [#allocation5], %s939_s26, %s939_s26, %s940_s27  }
 0x340   :  { %936 = dma.done.wait [#allocation5], 2048  }
 0x341   :  { %937 = vsyncadd [#allocation5], 4294965248 }
 0x342   :  { %823 = vsyncpa [#allocation4], 1 }
 0x343   :  { %824 = vsyncpa [#allocation7], 1 }
 0x344   :  { %825 = vsyncpa [#allocation5], 1 }

// kernel: tpu_custom_call.1
= control target key start
LH: loop header
LB: loop body
LE: loop exit
PB: predicated region body
PF: predicated region fallthrough
CT: control target
= control target key end

     0   :  { %11 = vsyncpa [#allocation4], 0  ;;  %s1201_s0 = inlined_call_operand.hbm [shape: f32[2,32,256], index: 0, kind: input, shape index: {}]   ;;  %s1202_s1 = inlined_call_operand.vmem [shape: f32[32,2], index: 1, kind: input, shape index: {}]   ;;  %s1203_s2 = inlined_call_operand.vmem [shape: f32[2,32], index: 2, kind: input, shape index: {}]   ;;  %s1204_s3 = inlined_call_operand.hbm [shape: f32[512,256], index: 3, kind: input, shape index: {}]   ;;  %s1205_s4 = inlined_call_operand.<no memory space> [shape: f32[1], index: 4, kind: input, shape index: {}]   ;;  %s1206_s5 = inlined_call_operand.hbm [shape: f32[2,32,256], index: 5, kind: output, shape index: {}]  }
   0x1   :  { %12 = vsyncpa [#allocation7], 0 }
   0x2   :  { %13 = vsyncpa [#allocation5], 0  ;;  %s18_s20 = sshll.u32 %s1201_s0, 4  ;;  %s938_s21 = smov [#allocation3]   ;;  %s19_s20 = int_to_ptr.hbm [resolvable:$true] %s18_s20 }
   0x3   :  { %s20_s22 = sshll.u32 %s938_s21, 4  ;;  %s35_s25 = sshll.u32 %s1204_s3, 4  ;;  %s21_s22 = int_to_ptr.vmem [resolvable:$true] %s20_s22  ;;  %s36_s25 = int_to_ptr.hbm [resolvable:$true] %s35_s25 }
   0x4   :  { %s939_s26 = smov 256   ;;  %s940_s27 = smov 16  }
   0x5   :  { %26 = dma.hbm_to_vmem [thread:$0]  %s19_s20, 2048, %s21_s22, [#allocation4], %s939_s26, %s939_s26, %s940_s27  }
   0x6   :  { %s941_s28 = smov [#allocation6]  }
   0x7   :  { %s37_s29 = sshll.u32 %s941_s28, 4  ;;  %s38_s29 = int_to_ptr.vmem [resolvable:$true] %s37_s29 }
   0x8   :  { %43 = dma.hbm_to_vmem [thread:$0]  %s36_s25, 16384, %s38_s29, [#allocation7], %s939_s26, %s939_s26, %s940_s27  }
   0x9   :  { %932 = dma.done.wait [#allocation4], 2048  }
   0xa   :  { %933 = vsyncadd [#allocation4], 4294965248 }
   0xb   :  { %934 = dma.done.wait [#allocation7], 16384  }
   0xc   :  { %935 = vsyncadd [#allocation7], 4294950912  ;;  %v986_v0 = vld [vmem:[#allocation3 + $0x40] sm:$0xff]  ;;  %v988_v1 = vld [vmem:[#allocation3 + $0x48] sm:$0xff]  ;;  %v134_v45 = vlaneseq  ;;  %vm139_vm0 = vcmask 130112   ;;  %vm143_vm1 = vcmask 195712  }
   0xd   :  { %v990_v2 = vld [vmem:[#allocation3] sm:$0xff]  ;;  %v82_v3 = vadd.f32 %v988_v1, %v986_v0  ;;  %v994_v4 = vld [vmem:[#allocation3 + $0x8] sm:$0xff]  ;;  %v1004_v9 = vld [vmem:[#allocation3 + $0x50] sm:$0xff]  ;;  %v114_v25 = vmax.f32 %v986_v0, %v988_v1  ;;  %vm147_vm2 = vcmask 261312   ;;  %vm156_vm3 = vcmask 1041409   ;;  %s812_s16 = sshll.u32 %s1206_s5, 4  ;;  %s813_s16 = int_to_ptr.hbm [resolvable:$true] %s812_s16 }
   0xe   :  { %v996_v5 = vld [vmem:[#allocation3 + $0x20] sm:$0xff]  ;;  %v998_v6 = vld [vmem:[#allocation3 + $0x28] sm:$0xff]  ;;  %v70_v7 = vadd.f32 %v994_v4, %v990_v2  ;;  %v1006_v10 = vld [vmem:[#allocation3 + $0x58] sm:$0xff]  ;;  %v102_v24 = vmax.f32 %v990_v2, %v994_v4  ;;  %v135_v49 = vand.u32 127, %v134_v45  ;;  %vm181_vm4 = vcmask 1043459  }
   0xf   :  { %v76_v8 = vadd.f32 %v998_v6, %v996_v5  ;;  %83 = vadd.xlane.f32.xlu1 %v82_v3  ;;  %v1008_v11 = vld [vmem:[#allocation3 + $0x10] sm:$0xff]  ;;  %v1010_v12 = vld [vmem:[#allocation3 + $0x18] sm:$0xff]  ;;  %v1012_v13 = vld [vmem:[#allocation3 + $0x60] sm:$0xff]  ;;  %v85_v15 = vadd.f32 %v1006_v10, %v1004_v9  ;;  %v117_v27 = vmax.f32 %v1004_v9, %v1006_v10  ;;  %v108_v29 = vmax.f32 %v996_v5, %v998_v6 }
  0x10   :  { %71 = vadd.xlane.f32.xlu0 %v70_v7  ;;  %v1014_v14 = vld [vmem:[#allocation3 + $0x68] sm:$0xff]  ;;  %v73_v16 = vadd.f32 %v1010_v12, %v1008_v11  ;;  %v1022_v18 = vld [vmem:[#allocation3 + $0x70] sm:$0xff]  ;;  %v1024_v19 = vld [vmem:[#allocation3 + $0x78] sm:$0xff]  ;;  %v105_v26 = vmax.f32 %v1008_v11, %v1010_v12  ;;  %v137_v51 = vadd.s32 4294967288, %v135_v49  ;;  %v141_v55 = vadd.s32 4294967280, %v135_v49 }
  0x11   :  { %77 = vadd.xlane.f32.xlu2 %v76_v8  ;;  %v88_v17 = vadd.f32 %v1014_v14, %v1012_v13  ;;  %v1026_v20 = vld [vmem:[#allocation3 + $0x30] sm:$0xff]  ;;  %v1028_v21 = vld [vmem:[#allocation3 + $0x38] sm:$0xff]  ;;  %v91_v22 = vadd.f32 %v1024_v19, %v1022_v18  ;;  %v120_v28 = vmax.f32 %v1012_v13, %v1014_v14  ;;  %v123_v31 = vmax.f32 %v1022_v18, %v1024_v19  ;;  %v187_v40 = vld [vmem:[%s1202_s1 + $0x8] sm:$0xff] }
  0x12   :  { %v79_v23 = vadd.f32 %v1028_v21, %v1026_v20  ;;  %v111_v30 = vmax.f32 %v1026_v20, %v1028_v21  ;;  %v189_v35 = vld [vmem:[%s1202_s1 + $0x18] sm:$0xff]  ;;  %v188_v39 = vld [vmem:[%s1202_s1 + $0x10] sm:$0xff]  ;;  %v186_v41 = vld [vmem:[%s1202_s1] sm:$0xff]  ;;  %v145_v59 = vadd.s32 4294967272, %v135_v49  ;;  %vm184_vm5 = vcmask 1041408  }
  0x13   :  { %207 = vmatpush.msra.mxu0 %v189_v35  ;;  %vm191_vm6 = vcmask 261120   ;;  %vm216_vm7 = vcmask 15360  }
  0x15   :  { %208 = vmatpush.msra.mxu0 %v188_v39 }
  0x17   :  { %86 = vadd.xlane.f32.xlu1 %v85_v15  ;;  %209 = vmatpush.msra.mxu0 %v187_v40 }
  0x18   :  { %74 = vadd.xlane.f32.xlu0 %v73_v16 }
  0x19   :  { %89 = vadd.xlane.f32.xlu2 %v88_v17  ;;  %210 = vmatpush.msra.mxu0 %v186_v41 }
  0x1f   :  { %92 = vadd.xlane.f32.xlu1 %v91_v22 }
  0x20   :  { %80 = vadd.xlane.f32.xlu0 %v79_v23 }
  0x21   :  { %103 = vmax.xlane.f32.xlu2 %v102_v24 }
  0x27   :  { %115 = vmax.xlane.f32.xlu1 %v114_v25 }
  0x28   :  { %106 = vmax.xlane.f32.xlu0 %v105_v26 }
  0x29   :  { %118 = vmax.xlane.f32.xlu2 %v117_v27 }
  0x2f   :  { %121 = vmax.xlane.f32.xlu1 %v120_v28 }
  0x30   :  { %109 = vmax.xlane.f32.xlu0 %v108_v29 }
  0x31   :  { %112 = vmax.xlane.f32.xlu2 %v111_v30 }
  0x38   :  { %124 = vmax.xlane.f32.xlu0 %v123_v31 }
  0x82   :  { %v84_v32 = vpop.xlane.xlu1 %83 }
  0x83   :  { %v72_v33 = vpop.xlane.xlu0 %71  ;;  %v98_v50 = vmul.f32 0.00390625, %v84_v32 }
  0x84   :  { %v78_v34 = vpop.xlane.xlu2 %77  ;;  %v94_v54 = vmul.f32 0.00390625, %v72_v33 }
  0x85   :  { %v149_v56 = vperm.slane %v98_v50, %v135_v49  ;;  %v96_v57 = vmul.f32 0.00390625, %v78_v34 }
  0x86   :  { %v136_v7 = vperm.slane %v94_v54, %v135_v49 }
  0x87   :  { %v142_v23 = vperm.slane %v96_v57, %v141_v55 }
  0x8a   :  { %v87_v36 = vpop.xlane.xlu1 %86 }
  0x8b   :  { %v75_v37 = vpop.xlane.xlu0 %74  ;;  %v99_v52 = vmul.f32 0.00390625, %v87_v36 }
  0x8c   :  { %v90_v38 = vpop.xlane.xlu2 %89  ;;  %v95_v53 = vmul.f32 0.00390625, %v75_v37 }
  0x8d   :  { %v100_v58 = vmul.f32 0.00390625, %v90_v38  ;;  %v150_v61 = vperm.slane %v99_v52, %v137_v51  ;;  %v268_v52 = vshrl.u32 %v134_v45, 7 }
  0x8e   :  { %v138_v62 = vperm.slane %v95_v53, %v137_v51 }
  0x8f   :  { %v152_v24 = vperm.slane %v100_v58, %v141_v55  ;;  %v151_v27 = vsel %vm139_vm0, %v150_v61, %v149_v56  ;;  %840 = vset.pattern.permute.xlu0 %v268_v52  ;;  %838 = vset.pattern.permute.xlu1 %v268_v52  ;;  %v275_v53 = vadd.s32 8, %v268_v52 }
  0x90   :  { %v140_v28 = vsel %vm139_vm0, %v138_v62, %v136_v7 }
  0x91   :  { %v153_v35 = vsel %vm143_vm1, %v152_v24, %v151_v27  ;;  %v144_v38 = vsel %vm143_vm1, %v142_v23, %v140_v28  ;;  %839 = vset.pattern.permute.xlu2 %v275_v53  ;;  %v281_v23 = vadd.s32 16, %v268_v52  ;;  %v287_v24 = vadd.s32 24, %v268_v52  ;;  %v461_v27 = vld [vmem:[#allocation6 + $0xf0] sm:$0xff] }
  0x92   :  { %v93_v42 = vpop.xlane.xlu1 %92  ;;  %v493_v28 = vld [vmem:[#allocation6 + $0x1f0] sm:$0xff]  ;;  %561 = vmatpush.msra.mxu2 %v461_v27 }
  0x93   :  { %v81_v43 = vpop.xlane.xlu0 %80  ;;  %v101_v63 = vmul.f32 0.00390625, %v93_v42  ;;  %581 = vmatpush.msra.mxu3 %v493_v28  ;;  %v449_v52 = vld [vmem:[#allocation6 + $0x90] sm:$0xff] }
  0x94   :  { %v104_v44 = vpop.xlane.xlu2 %103  ;;  %v97_v3 = vmul.f32 0.00390625, %v81_v43  ;;  %v481_v53 = vld [vmem:[#allocation6 + $0x190] sm:$0xff] }
  0x95   :  { %v167_v8 = vperm.slane %v104_v44, %v135_v49  ;;  %v154_v29 = vperm.slane %v101_v63, %v145_v59  ;;  %v437_v28 = vld [vmem:[#allocation6 + $0x30] sm:$0xff] }
  0x96   :  { %v146_v30 = vperm.slane %v97_v3, %v145_v59 }
  0x97   :  { %v155_v41 = vsel %vm147_vm2, %v154_v29, %v153_v35  ;;  %v523_v29 = vld [vmem:[#allocation6 + $0x2e0] sm:$0xff]  ;;  %v457_v35 = vld [vmem:[#allocation6 + $0xd0] sm:$0xff] }
  0x98   :  { %v148_v40 = vsel %vm147_vm2, %v146_v30, %v144_v38  ;;  %v555_v30 = vld [vmem:[#allocation6 + $0x3e0] sm:$0xff] }
  0x99   :  { %v551_v38 = vld [vmem:[#allocation6 + $0x3c0] sm:$0xff] }
  0x9a   :  { %v116_v47 = vpop.xlane.xlu1 %115 }
  0x9b   :  { %v107_v46 = vpop.xlane.xlu0 %106  ;;  %v174_v15 = vperm.slane %v116_v47, %v135_v49  ;;  %v190_v49 = vld [vmem:[%s1203_s2] sm:$0x3] }
  0x9c   :  { %v119_v48 = vpop.xlane.xlu2 %118  ;;  %v168_v16 = vperm.slane %v107_v46, %v137_v51  ;;  %v157_v46 = vsel %vm156_vm3, %v155_v41, %v148_v40  ;;  %827 = vmatpush.msk.msra.mxu1 %vm184_vm5, %v190_v49  ;;  %v487_v40 = vld [vmem:[#allocation6 + $0x1c0] sm:$0xff]  ;;  %v517_v41 = vld [vmem:[#allocation6 + $0x2b0] sm:$0xff] }
  0x9d   :  { %v175_v17 = vperm.slane %v119_v48, %v137_v51  ;;  %v483_v49 = vld [vmem:[#allocation6 + $0x1a0] sm:$0xff] }
  0x9e   :  { %v169_v32 = vsel %vm139_vm0, %v168_v16, %v167_v8 }
  0x9f   :  { %v176_v33 = vsel %vm139_vm0, %v175_v17, %v174_v15 }
  0xa2   :  { %v122_v22 = vpop.xlane.xlu1 %121 }
  0xa3   :  { %v110_v60 = vpop.xlane.xlu0 %109  ;;  %v177_v31 = vperm.slane %v122_v22, %v141_v55 }
  0xa4   :  { %v170_v25 = vperm.slane %v110_v60, %v141_v55  ;;  %v113_v26 = vpop.xlane.xlu2 %112 }
  0xa5   :  { %v172_v34 = vperm.slane %v113_v26, %v145_v59  ;;  %v178_v42 = vsel %vm143_vm1, %v177_v31, %v176_v33  ;;  %v557_v26 = vld [vmem:[#allocation6 + $0x3f0] sm:$0xff]  ;;  %v459_v31 = vld [vmem:[#allocation6 + $0xe0] sm:$0xff] }
  0xa6   :  { %v171_v36 = vsel %vm143_vm1, %v170_v25, %v169_v32  ;;  %v525_v25 = vld [vmem:[#allocation6 + $0x2f0] sm:$0xff]  ;;  %621 = vmatpush.msrb.mxu0 %v557_v26  ;;  %v491_v32 = vld [vmem:[#allocation6 + $0x1e0] sm:$0xff]  ;;  %562 = vmatpush.msra.mxu2 %v459_v31 }
  0xa7   :  { %v173_v43 = vsel %vm147_vm2, %v172_v34, %v171_v36  ;;  %601 = vmatpush.msrb.mxu1 %v525_v25  ;;  %v521_v33 = vld [vmem:[#allocation6 + $0x2d0] sm:$0xff]  ;;  %582 = vmatpush.msra.mxu3 %v491_v32  ;;  %v531_v31 = vld [vmem:[#allocation6 + $0x320] sm:$0xff] }
  0xa8   :  { %622 = vmatpush.msrb.mxu0 %v555_v30  ;;  %v553_v34 = vld [vmem:[#allocation6 + $0x3d0] sm:$0xff]  ;;  %563 = vmatpush.msra.mxu2 %v457_v35  ;;  %v499_v30 = vld [vmem:[#allocation6 + $0x220] sm:$0xff] }
  0xa9   :  { %602 = vmatpush.msrb.mxu1 %v523_v29  ;;  %v489_v36 = vld [vmem:[#allocation6 + $0x1d0] sm:$0xff]  ;;  %v435_v32 = vld [vmem:[#allocation6 + $0x20] sm:$0xff] }
  0xaa   :  { %623 = vmatpush.msrb.mxu0 %v553_v34  ;;  %583 = vmatpush.msra.mxu3 %v489_v36  ;;  %v501_v25 = vld [vmem:[#allocation6 + $0x230] sm:$0xff] }
  0xab   :  { %v125_v37 = vpop.xlane.xlu0 %124  ;;  %603 = vmatpush.msrb.mxu1 %v521_v33  ;;  %v533_v26 = vld [vmem:[#allocation6 + $0x330] sm:$0xff]  ;;  %v467_v33 = vld [vmem:[#allocation6 + $0x120] sm:$0xff] }
  0xac   :  { %v179_v39 = vperm.slane %v125_v37, %v145_v59  ;;  %v519_v37 = vld [vmem:[#allocation6 + $0x2c0] sm:$0xff]  ;;  %624 = vmatpush.msrb.mxu0 %v551_v38  ;;  %584 = vmatpush.msra.mxu3 %v487_v40  ;;  %v469_v29 = vld [vmem:[#allocation6 + $0x130] sm:$0xff]  ;;  %v526_v40 = vld [vmem:[#allocation6 + $0x2f8] sm:$0xff] }
  0xad   :  { %604 = vmatpush.msrb.mxu1 %v519_v37  ;;  %v497_v34 = vld [vmem:[#allocation6 + $0x210] sm:$0xff]  ;;  %v495_v38 = vld [vmem:[#allocation6 + $0x200] sm:$0xff] }
  0xae   :  { %v180_v44 = vsel %vm147_vm2, %v179_v39, %v178_v42  ;;  %v455_v39 = vld [vmem:[#allocation6 + $0xc0] sm:$0xff]  ;;  %v549_v42 = vld [vmem:[#allocation6 + $0x3b0] sm:$0xff] }
  0xaf   :  { %v182_v47 = vsel %vm181_vm4, %v180_v44, %v173_v43  ;;  %564 = vmatpush.msra.mxu2 %v455_v39  ;;  %v453_v43 = vld [vmem:[#allocation6 + $0xb0] sm:$0xff]  ;;  %605 = vmatpush.msrb.mxu1 %v517_v41  ;;  %v527_v39 = vld [vmem:[#allocation6 + $0x300] sm:$0xff]  ;;  %v558_v41 = vld [vmem:[#allocation6 + $0x3f8] sm:$0xff] }
  0xb0   :  { %v185_v48 = vsel %vm184_vm5, %v157_v46, %v182_v47  ;;  %v485_v44 = vld [vmem:[#allocation6 + $0x1b0] sm:$0xff]  ;;  %625 = vmatpush.msrb.mxu0 %v549_v42  ;;  %v515_v46 = vld [vmem:[#allocation6 + $0x2a0] sm:$0xff]  ;;  %vm762_vm5 = vcmask 1040384  }
  0xb1   :  { %826 = vmatmul.msk.f32.vlgmr.msra.gmra.mxu0 %vm191_vm6, %v185_v48  ;;  %v547_v47 = vld [vmem:[#allocation6 + $0x3a0] sm:$0xff]  ;;  %565 = vmatpush.msra.mxu2 %v453_v43  ;;  %v529_v35 = vld [vmem:[#allocation6 + $0x310] sm:$0xff] }
  0xb2   :  { %v451_v48 = vld [vmem:[#allocation6 + $0xa0] sm:$0xff]  ;;  %585 = vmatpush.msra.mxu3 %v485_v44  ;;  %606 = vmatpush.msrb.mxu1 %v515_v46  ;;  %v433_v36 = vld [vmem:[#allocation6 + $0x10] sm:$0xff]  ;;  %v462_v44 = vld [vmem:[#allocation6 + $0xf8] sm:$0xff] }
  0xb3   :  { %626 = vmatpush.msrb.mxu0 %v547_v47  ;;  %566 = vmatpush.msra.mxu2 %v451_v48  ;;  %v465_v37 = vld [vmem:[#allocation6 + $0x110] sm:$0xff]  ;;  %v431_v42 = vld [vmem:[#allocation6] sm:$0xff]  ;;  %v494_v46 = vld [vmem:[#allocation6 + $0x1f8] sm:$0xff] }
  0xb4   :  { %586 = vmatpush.msra.mxu3 %v483_v49  ;;  %v463_v43 = vld [vmem:[#allocation6 + $0x100] sm:$0xff]  ;;  %v524_v47 = vld [vmem:[#allocation6 + $0x2e8] sm:$0xff] }
  0xb5   :  { %567 = vmatpush.msra.mxu2 %v449_v52  ;;  %v556_v48 = vld [vmem:[#allocation6 + $0x3e8] sm:$0xff] }
  0xb6   :  { %587 = vmatpush.msra.mxu3 %v481_v53  ;;  %v460_v49 = vld [vmem:[#allocation6 + $0xe8] sm:$0xff]  ;;  %v554_v53 = vld [vmem:[#allocation6 + $0x3d8] sm:$0xff] }
 0x12e   :  { %v212_v50 = vpop.f32.mrf.mxu0 }
 0x12f   :  { %v215_v51 = vmax.f32 %v212_v50, 0.0  ;;  %v513_v50 = vld [vmem:[#allocation6 + $0x290] sm:$0xff] }
 0x130   :  { %607 = vmatpush.msrb.mxu1 %v513_v50  ;;  %v492_v50 = vld [vmem:[#allocation6 + $0x1e8] sm:$0xff] }
 0x131   :  { %828 = vmatmul.msk.f32.vlgmr.msra.gmra.mxu1 %vm216_vm7, %v215_v51  ;;  %v545_v51 = vld [vmem:[#allocation6 + $0x390] sm:$0xff] }
 0x132   :  { %627 = vmatpush.msrb.mxu0 %v545_v51  ;;  %v522_v51 = vld [vmem:[#allocation6 + $0x2d8] sm:$0xff] }
 0x1ae   :  { %v240_v54 = vpop.f32.mrf.mxu1 }
 0x1af   :  { %v244_v55 = vrot.slane %v240_v54, 2 }
 0x1b1   :  { %v246_v56 = vadd.f32 %v244_v55, %v240_v54  ;;  %v511_v54 = vld [vmem:[#allocation6 + $0x280] sm:$0xff] }
 0x1b2   :  { %v543_v55 = vld [vmem:[#allocation6 + $0x380] sm:$0xff]  ;;  %608 = vmatpush.msrb.mxu1 %v511_v54  ;;  %v458_v54 = vld [vmem:[#allocation6 + $0xd8] sm:$0xff] }
 0x1b3   :  { %v829_v57 = vmul.f32 -1.442695, %v246_v56  ;;  %v447_v56 = vld [vmem:[#allocation6 + $0x80] sm:$0xff]  ;;  %628 = vmatpush.msrb.mxu0 %v543_v55  ;;  %v490_v55 = vld [vmem:[#allocation6 + $0x1d8] sm:$0xff] }
 0x1b4   :  { %568 = vmatpush.msra.mxu2 %v447_v56  ;;  %v520_v56 = vld [vmem:[#allocation6 + $0x2c8] sm:$0xff] }
 0x1b5   :  { %846 = vpow2.f32 %v829_v57  ;;  %v479_v57 = vld [vmem:[#allocation6 + $0x180] sm:$0xff] }
 0x1b6   :  { %588 = vmatpush.msra.mxu3 %v479_v57  ;;  %v552_v57 = vld [vmem:[#allocation6 + $0x3c8] sm:$0xff] }
 0x1bb   :  { %v847_v58 = vpop.eup %846 }
 0x1bc   :  { %v250_v59 = vadd.f32 1.0, %v847_v58  ;;  %v509_v58 = vld [vmem:[#allocation6 + $0x270] sm:$0xff] }
 0x1bd   :  { %609 = vmatpush.msrb.mxu1 %v509_v58  ;;  %v456_v58 = vld [vmem:[#allocation6 + $0xc8] sm:$0xff] }
 0x1be   :  { %848 = vrcp.f32 %v250_v59  ;;  %v262_v63 = vand.u32 2147483648, %v250_v59  ;;  %v260_v7 = vand.u32 2147483647, %v250_v59  ;;  %vm256_vm9 = vweird.f32 %v250_v59 }
 0x1c0   :  { %v263_v8 = vor.u32 1.1754944e-38, %v262_v63  ;;  %vm261_vm11 = vcmp.eq.f32.partialorder %v260_v7, 8.507059e+37  ;;  %v539_v63 = vld [vmem:[#allocation6 + $0x360] sm:$0xff] }
 0x1c1   :  { %v475_v7 = vld [vmem:[#allocation6 + $0x160] sm:$0xff] }
 0x1c4   :  { %v849_v60 = vpop.eup %848 }
 0x1c5   :  { %v252_v61 = vmul.f32 %v849_v60, %v250_v59  ;;  %vm257_vm8 = vweird.f32 %v849_v60  ;;  %v541_v59 = vld [vmem:[#allocation6 + $0x370] sm:$0xff] }
 0x1c6   :  { %vm258_vm10 = vmor %vm256_vm9, %vm257_vm8  ;;  %629 = vmatpush.msrb.mxu0 %v541_v59  ;;  %v488_v59 = vld [vmem:[#allocation6 + $0x1c8] sm:$0xff] }
 0x1c7   :  { %v253_v62 = vsub.f32 1.0, %v252_v61  ;;  %v477_v61 = vld [vmem:[#allocation6 + $0x170] sm:$0xff] }
 0x1c8   :  { %589 = vmatpush.msra.mxu3 %v477_v61  ;;  %630 = vmatpush.msrb.mxu0 %v539_v63  ;;  %v550_v61 = vld [vmem:[#allocation6 + $0x3b8] sm:$0xff] }
 0x1c9   :  { %v254_v3 = vmul.f32 %v849_v60, %v253_v62  ;;  %v507_v62 = vld [vmem:[#allocation6 + $0x260] sm:$0xff]  ;;  %v486_v63 = vld [vmem:[#allocation6 + $0x1b8] sm:$0xff] }
 0x1ca   :  { %610 = vmatpush.msrb.mxu1 %v507_v62  ;;  %590 = vmatpush.msra.mxu3 %v475_v7  ;;  %v454_v62 = vld [vmem:[#allocation6 + $0xb8] sm:$0xff]  ;;  %v548_v7 = vld [vmem:[#allocation6 + $0x3a8] sm:$0xff] }
 0x1cb   :  { %v255_v45 = vadd.f32 %v849_v60, %v254_v3  ;;  %v443_v3 = vld [vmem:[#allocation6 + $0x60] sm:$0xff] }
 0x1cd   :  { %v259_v15 = vsel %vm258_vm10, %v849_v60, %v255_v45  ;;  %v445_v60 = vld [vmem:[#allocation6 + $0x70] sm:$0xff] }
 0x1ce   :  { %v264_v16 = vsel %vm261_vm11, %v263_v8, %v259_v15  ;;  %569 = vmatpush.msra.mxu2 %v445_v60  ;;  %v505_v45 = vld [vmem:[#allocation6 + $0x250] sm:$0xff]  ;;  %v518_v60 = vld [vmem:[#allocation6 + $0x2b8] sm:$0xff] }
 0x1cf   :  { %v291_v17 = vperm.slane %v264_v16, 1  ;;  %v266_v22 = vperm.slane %v264_v16, 0  ;;  %v537_v8 = vld [vmem:[#allocation6 + $0x350] sm:$0xff]  ;;  %611 = vmatpush.msrb.mxu1 %v505_v45 }
 0x1d0   :  { %570 = vmatpush.msra.mxu2 %v443_v3  ;;  %631 = vmatpush.msrb.mxu0 %v537_v8  ;;  %v441_v15 = vld [vmem:[#allocation6 + $0x50] sm:$0xff]  ;;  %v516_v3 = vld [vmem:[#allocation6 + $0x2a8] sm:$0xff] }
 0x1d1   :  { %296 = vperm.xlu0 %840, %v291_v17   ;;  %277 = vperm.xlu2 %839, %v266_v22   ;;  %v473_v16 = vld [vmem:[#allocation6 + $0x150] sm:$0xff] }
 0x1d2   :  { %271 = vperm.xlu1 %838, %v266_v22   ;;  %571 = vmatpush.msra.mxu2 %v441_v15  ;;  %v452_v15 = vld [vmem:[#allocation6 + $0xa8] sm:$0xff] }
 0x1d3   :  { %591 = vmatpush.msra.mxu3 %v473_v16  ;;  %v484_v16 = vld [vmem:[#allocation6 + $0x1a8] sm:$0xff] }
 0x1d9   :  { %302 = vperm.xlu2 %839, %v291_v17   ;;  %845 = vset.pattern.permute.xlu0 %v287_v24 }
 0x1da   :  { %841 = vset.pattern.permute.xlu1 %v281_v23 }
 0x1e1   :  { %842 = vset.pattern.permute.xlu2 %v281_v23  ;;  %v439_v23 = vld [vmem:[#allocation6 + $0x40] sm:$0xff] }
 0x1e2   :  { %283 = vperm.xlu1 %841, %v266_v22   ;;  %572 = vmatpush.msra.mxu2 %v439_v23  ;;  %v450_v23 = vld [vmem:[#allocation6 + $0x98] sm:$0xff] }
 0x1e4   :  { %573 = vmatpush.msra.mxu2 %v437_v28  ;;  %v512_v28 = vld [vmem:[#allocation6 + $0x288] sm:$0xff] }
 0x1e6   :  { %574 = vmatpush.msra.mxu2 %v435_v32 }
 0x1e8   :  { %575 = vmatpush.msra.mxu2 %v433_v36 }
 0x1e9   :  { %308 = vperm.xlu2 %842, %v291_v17  }
 0x1ea   :  { %843 = vset.pattern.permute.xlu1 %v287_v24  ;;  %576 = vmatpush.msra.mxu2 %v431_v42  ;;  %v444_v42 = vld [vmem:[#allocation6 + $0x68] sm:$0xff] }
 0x1ec   :  { %641 = vmatpush.msrb.mxu2 %v462_v44 }
 0x1ee   :  { %642 = vmatpush.msrb.mxu2 %v460_v49 }
 0x1f0   :  { %643 = vmatpush.msrb.mxu2 %v458_v54 }
 0x1f1   :  { %844 = vset.pattern.permute.xlu2 %v287_v24  ;;  %v471_v24 = vld [vmem:[#allocation6 + $0x140] sm:$0xff] }
 0x1f2   :  { %289 = vperm.xlu1 %843, %v266_v22   ;;  %v535_v22 = vld [vmem:[#allocation6 + $0x340] sm:$0xff]  ;;  %592 = vmatpush.msra.mxu3 %v471_v24  ;;  %v482_v24 = vld [vmem:[#allocation6 + $0x198] sm:$0xff] }
 0x1f3   :  { %632 = vmatpush.msrb.mxu0 %v535_v22  ;;  %644 = vmatpush.msrb.mxu2 %v456_v58  ;;  %v546_v22 = vld [vmem:[#allocation6 + $0x398] sm:$0xff]  ;;  %v440_v58 = vld [vmem:[#allocation6 + $0x48] sm:$0xff] }
 0x1f4   :  { %593 = vmatpush.msra.mxu3 %v469_v29  ;;  %v544_v29 = vld [vmem:[#allocation6 + $0x388] sm:$0xff] }
 0x1f5   :  { %633 = vmatpush.msrb.mxu0 %v533_v26  ;;  %645 = vmatpush.msrb.mxu2 %v454_v62 }
 0x1f6   :  { %594 = vmatpush.msra.mxu3 %v467_v33 }
 0x1f7   :  { %634 = vmatpush.msrb.mxu0 %v531_v31  ;;  %646 = vmatpush.msrb.mxu2 %v452_v15  ;;  %v480_v31 = vld [vmem:[#allocation6 + $0x188] sm:$0xff] }
 0x1f8   :  { %595 = vmatpush.msra.mxu3 %v465_v37 }
 0x1f9   :  { %314 = vperm.xlu2 %844, %v291_v17   ;;  %v503_v17 = vld [vmem:[#allocation6 + $0x240] sm:$0xff]  ;;  %635 = vmatpush.msrb.mxu0 %v529_v35  ;;  %v478_v35 = vld [vmem:[#allocation6 + $0x178] sm:$0xff] }
 0x1fa   :  { %612 = vmatpush.msrb.mxu1 %v503_v17  ;;  %596 = vmatpush.msra.mxu3 %v463_v43  ;;  %v514_v17 = vld [vmem:[#allocation6 + $0x298] sm:$0xff] }
 0x1fb   :  { %636 = vmatpush.msrb.mxu0 %v527_v39  ;;  %647 = vmatpush.msrb.mxu2 %v450_v23  ;;  %v436_v23 = vld [vmem:[#allocation6 + $0x28] sm:$0xff] }
 0x1fc   :  { %613 = vmatpush.msrb.mxu1 %v501_v25  ;;  %661 = vmatpush.msrb.mxu3 %v494_v46 }
 0x1fd   :  { %701 = vmatpush.msra.mxu0 %v558_v41 }
 0x1fe   :  { %614 = vmatpush.msrb.mxu1 %v499_v30  ;;  %662 = vmatpush.msrb.mxu3 %v492_v50  ;;  %v448_v30 = vld [vmem:[#allocation6 + $0x88] sm:$0xff] }
 0x1ff   :  { %702 = vmatpush.msra.mxu0 %v556_v48  ;;  %648 = vmatpush.msrb.mxu2 %v448_v30  ;;  %v538_v48 = vld [vmem:[#allocation6 + $0x358] sm:$0xff] }
 0x200   :  { %615 = vmatpush.msrb.mxu1 %v497_v34  ;;  %663 = vmatpush.msrb.mxu3 %v490_v55  ;;  %v542_v34 = vld [vmem:[#allocation6 + $0x378] sm:$0xff] }
 0x201   :  { %703 = vmatpush.msra.mxu0 %v554_v53  ;;  %v942_v53 = vmov 32.0  }
 0x202   :  { %616 = vmatpush.msrb.mxu1 %v495_v38  ;;  %664 = vmatpush.msrb.mxu3 %v488_v59  ;;  %v540_v38 = vld [vmem:[#allocation6 + $0x368] sm:$0xff]  ;;  %850 = vrcp.f32 %v942_v53 }
 0x203   :  { %704 = vmatpush.msra.mxu0 %v552_v57  ;;  %v536_v57 = vld [vmem:[#allocation6 + $0x348] sm:$0xff] }
 0x204   :  { %681 = vmatpush.msra.mxu1 %v526_v40  ;;  %665 = vmatpush.msrb.mxu3 %v486_v63  ;;  %v472_v59 = vld [vmem:[#allocation6 + $0x148] sm:$0xff]  ;;  %v534_v63 = vld [vmem:[#allocation6 + $0x338] sm:$0xff] }
 0x205   :  { %705 = vmatpush.msra.mxu0 %v550_v61 }
 0x206   :  { %682 = vmatpush.msra.mxu1 %v524_v47  ;;  %666 = vmatpush.msrb.mxu3 %v484_v16 }
 0x207   :  { %706 = vmatpush.msra.mxu0 %v548_v7  ;;  %v470_v7 = vld [vmem:[#allocation6 + $0x138] sm:$0xff] }
 0x208   :  { %683 = vmatpush.msra.mxu1 %v522_v51  ;;  %667 = vmatpush.msrb.mxu3 %v482_v24  ;;  %v442_v51 = vld [vmem:[#allocation6 + $0x58] sm:$0xff]  ;;  %v468_v24 = vld [vmem:[#allocation6 + $0x128] sm:$0xff] }
 0x209   :  { %707 = vmatpush.msra.mxu0 %v546_v22  ;;  %v532_v22 = vld [vmem:[#allocation6 + $0x328] sm:$0xff] }
 0x20a   :  { %684 = vmatpush.msra.mxu1 %v520_v56  ;;  %668 = vmatpush.msrb.mxu3 %v480_v31 }
 0x20b   :  { %708 = vmatpush.msra.mxu0 %v544_v29 }
 0x20c   :  { %685 = vmatpush.msra.mxu1 %v518_v60  ;;  %669 = vmatpush.msrb.mxu3 %v478_v35  ;;  %v502_v60 = vld [vmem:[#allocation6 + $0x238] sm:$0xff] }
 0x20d   :  { %709 = vmatpush.msra.mxu0 %v542_v34  ;;  %v530_v34 = vld [vmem:[#allocation6 + $0x318] sm:$0xff] }
 0x20e   :  { %686 = vmatpush.msra.mxu1 %v516_v3  ;;  %v438_v3 = vld [vmem:[#allocation6 + $0x38] sm:$0xff] }
 0x20f   :  { %710 = vmatpush.msra.mxu0 %v540_v38 }
 0x210   :  { %687 = vmatpush.msra.mxu1 %v514_v17  ;;  %v500_v17 = vld [vmem:[#allocation6 + $0x228] sm:$0xff] }
 0x211   :  { %711 = vmatpush.msra.mxu0 %v538_v48 }
 0x212   :  { %688 = vmatpush.msra.mxu1 %v512_v28 }
 0x213   :  { %712 = vmatpush.msra.mxu0 %v536_v57 }
 0x215   :  { %713 = vmatpush.msra.mxu0 %v534_v63 }
 0x217   :  { %714 = vmatpush.msra.mxu0 %v532_v22 }
 0x219   :  { %715 = vmatpush.msra.mxu0 %v530_v34 }
 0x22b   :  { %v1080_v27 = vpop.permute.xlu2 %277 }
 0x22c   :  { %v1136_v35 = vmul.f32 %v1080_v27, %v1010_v12  ;;  %v528_v12 = vld [vmem:[#allocation6 + $0x308] sm:$0xff] }
 0x22d   :  { %716 = vmatpush.msra.mxu0 %v528_v12 }
 0x233   :  { %v303_v52 = vpop.permute.xlu2 %302 }
 0x234   :  { %v1089_v32 = vmul.f32 %v303_v52, %v1004_v9  ;;  %v1092_v33 = vmul.f32 %v303_v52, %v1006_v10  ;;  %v508_v9 = vld [vmem:[#allocation6 + $0x268] sm:$0xff]  ;;  %v474_v52 = vld [vmem:[#allocation6 + $0x158] sm:$0xff] }
 0x243   :  { %v297_v45 = vpop.permute.xlu0 %296  ;;  %v309_v8 = vpop.permute.xlu2 %308 }
 0x244   :  { %v1083_v25 = vmul.f32 %v297_v45, %v986_v0  ;;  %v1086_v26 = vmul.f32 %v297_v45, %v988_v1  ;;  %v510_v0 = vld [vmem:[#allocation6 + $0x278] sm:$0xff]  ;;  %v1101_v39 = vmul.f32 %v309_v8, %v1012_v13  ;;  %v1104_v40 = vmul.f32 %v309_v8, %v1014_v14  ;;  %v272_v44 = vpop.permute.xlu1 %271  ;;  %v476_v13 = vld [vmem:[#allocation6 + $0x168] sm:$0xff]  ;;  %v1122_v45 = vpop.eup %850 }
 0x245   :  { %v446_v1 = vld [vmem:[#allocation6 + $0x78] sm:$0xff]  ;;  %689 = vmatpush.msra.mxu1 %v510_v0  ;;  %670 = vmatpush.msrb.mxu3 %v476_v13  ;;  %v1125_v28 = vmul.f32 %v272_v44, %v990_v2  ;;  %v1128_v29 = vmul.f32 %v272_v44, %v994_v4  ;;  %v369_v2 = vmul.f32 32.0, %v1122_v45  ;;  %v464_v44 = vld [vmem:[#allocation6 + $0x108] sm:$0xff]  ;;  %vm373_vm12 = vweird.f32 %v1122_v45 }
 0x246   :  { %v350_v36 = vadd.f32 %v1089_v32, %v1083_v25  ;;  %v359_v37 = vadd.f32 %v1092_v33, %v1086_v26  ;;  %v397_v10 = vmax.f32 %v1083_v25, %v1089_v32  ;;  %v406_v43 = vmax.f32 %v1086_v26, %v1092_v33  ;;  %649 = vmatpush.msrb.mxu2 %v446_v1  ;;  %v506_v14 = vld [vmem:[#allocation6 + $0x258] sm:$0xff] }
 0x247   :  { %690 = vmatpush.msra.mxu1 %v508_v9  ;;  %671 = vmatpush.msrb.mxu3 %v474_v52  ;;  %v498_v0 = vld [vmem:[#allocation6 + $0x218] sm:$0xff]  ;;  %v1132_v1 = vmul.f32 %v1080_v27, %v1008_v11  ;;  %v432_v27 = vld [vmem:[#allocation6 + $0x8] sm:$0xff]  ;;  %v388_v13 = vmax.f32 %v1128_v29, %v1136_v35 }
 0x248   :  { %v351_v49 = vadd.f32 %v350_v36, %v1101_v39  ;;  %v360_v50 = vadd.f32 %v359_v37, %v1104_v40  ;;  %650 = vmatpush.msrb.mxu2 %v444_v42  ;;  %v407_v54 = vmax.f32 %v406_v43, %v1104_v40  ;;  %v434_v4 = vld [vmem:[#allocation6 + $0x18] sm:$0xff] }
 0x249   :  { %691 = vmatpush.msra.mxu1 %v506_v14  ;;  %672 = vmatpush.msrb.mxu3 %v472_v59  ;;  %v466_v11 = vld [vmem:[#allocation6 + $0x118] sm:$0xff]  ;;  %v370_v14 = vsub.f32 1.0, %v369_v2 }
 0x24a   :  { %651 = vmatpush.msrb.mxu2 %v442_v51 }
 0x24b   :  { %673 = vmatpush.msrb.mxu3 %v470_v7 }
 0x24c   :  { %652 = vmatpush.msrb.mxu2 %v440_v58 }
 0x24d   :  { %674 = vmatpush.msrb.mxu3 %v468_v24 }
 0x24e   :  { %653 = vmatpush.msrb.mxu2 %v438_v3 }
 0x24f   :  { %675 = vmatpush.msrb.mxu3 %v466_v11 }
 0x250   :  { %654 = vmatpush.msrb.mxu2 %v436_v23 }
 0x251   :  { %676 = vmatpush.msrb.mxu3 %v464_v44 }
 0x252   :  { %655 = vmatpush.msrb.mxu2 %v434_v4 }
 0x253   :  { %v315_v41 = vpop.permute.xlu2 %314 }
 0x254   :  { %v1109_v46 = vmul.f32 %v315_v41, %v1022_v18  ;;  %v1112_v47 = vmul.f32 %v315_v41, %v1024_v19  ;;  %v398_v18 = vmax.f32 %v397_v10, %v1101_v39  ;;  %v504_v19 = vld [vmem:[#allocation6 + $0x248] sm:$0xff]  ;;  %v284_v16 = vpop.permute.xlu1 %283  ;;  %v341_v41 = vadd.f32 %v1136_v35, %v1128_v29  ;;  %656 = vmatpush.msrb.mxu2 %v432_v27 }
 0x255   :  { %692 = vmatpush.msra.mxu1 %v504_v19  ;;  %v1139_v36 = vmul.f32 %v284_v16, %v996_v5  ;;  %v1143_v38 = vmul.f32 %v284_v16, %v998_v6  ;;  %v496_v10 = vld [vmem:[#allocation6 + $0x208] sm:$0xff]  ;;  %v332_v5 = vadd.f32 %v1132_v1, %v1125_v28  ;;  %v379_v6 = vmax.f32 %v1125_v28, %v1132_v1 }
 0x256   :  { %v352_v55 = vadd.f32 %v351_v49, %v1109_v46  ;;  %v361_v56 = vadd.f32 %v360_v50, %v1112_v47  ;;  %v399_v61 = vmax.f32 %v398_v18, %v1109_v46  ;;  %v408_v62 = vmax.f32 %v407_v54, %v1112_v47 }
 0x257   :  { %693 = vmatpush.msra.mxu1 %v502_v60  ;;  %v333_v50 = vadd.f32 %v332_v5, %v1139_v36  ;;  %v342_v51 = vadd.f32 %v341_v41, %v1143_v38  ;;  %v380_v53 = vmax.f32 %v379_v6, %v1139_v36  ;;  %v389_v18 = vmax.f32 %v388_v13, %v1143_v38 }
 0x258   :  { %v353_v8 = vrot.slane %v352_v55, 4  ;;  %v362_v15 = vrot.slane %v361_v56, 4  ;;  %v400_v30 = vrot.slane %v399_v61, 4  ;;  %v409_v31 = vrot.slane %v408_v62, 4 }
 0x259   :  { %694 = vmatpush.msra.mxu1 %v500_v17 }
 0x25a   :  { %v354_v37 = vadd.f32 %v353_v8, %v352_v55  ;;  %v363_v9 = vadd.f32 %v362_v15, %v361_v56  ;;  %v401_v42 = vmax.f32 %v399_v61, %v400_v30  ;;  %v410_v43 = vmax.f32 %v408_v62, %v409_v31 }
 0x25b   :  { %695 = vmatpush.msra.mxu1 %v498_v0  ;;  %v371_v62 = vmul.f32 %v1122_v45, %v370_v14 }
 0x25c   :  { %v355_v48 = vrot.slane %v354_v37, 2  ;;  %v364_v49 = vrot.slane %v363_v9, 2  ;;  %v402_v55 = vrot.slane %v401_v42, 2  ;;  %v411_v56 = vrot.slane %v410_v43, 2 }
 0x25d   :  { %696 = vmatpush.msra.mxu1 %v496_v10  ;;  %v372_v30 = vadd.f32 %v1122_v45, %v371_v62 }
 0x25e   :  { %v356_v61 = vadd.f32 %v355_v48, %v354_v37  ;;  %v365_v63 = vadd.f32 %v364_v49, %v363_v9  ;;  %v403_v8 = vmax.f32 %v401_v42, %v402_v55  ;;  %v412_v15 = vmax.f32 %v410_v43, %v411_v56 }
 0x25f   :  { %v374_v41 = vsel %vm373_vm12, %v1122_v45, %v372_v30 }
 0x260   :  { %v357_v24 = vrot.slane %v356_v61, 1  ;;  %v366_v31 = vrot.slane %v365_v63, 1  ;;  %v404_v37 = vrot.slane %v403_v8, 1  ;;  %v413_v9 = vrot.slane %v412_v15, 1 }
 0x262   :  { %v358_v5 = vadd.f32 %v357_v24, %v356_v61  ;;  %v367_v42 = vadd.f32 %v366_v31, %v365_v63  ;;  %v405_v14 = vmax.f32 %v403_v8, %v404_v37  ;;  %v414_v48 = vmax.f32 %v412_v15, %v413_v9 }
 0x264   :  { %v290_v52 = vpop.permute.xlu1 %289 }
 0x265   :  { %v1158_v19 = vmul.f32 %v290_v52, %v1026_v20  ;;  %v1161_v54 = vmul.f32 %v290_v52, %v1028_v21 }
 0x267   :  { %v334_v57 = vadd.f32 %v333_v50, %v1158_v19  ;;  %v343_v58 = vadd.f32 %v342_v51, %v1161_v54  ;;  %v381_v59 = vmax.f32 %v380_v53, %v1158_v19  ;;  %v390_v60 = vmax.f32 %v389_v18, %v1161_v54 }
 0x268   :  { %v377_v53 = vmul.f32 %v374_v41, %v358_v5  ;;  %v378_v18 = vmul.f32 %v374_v41, %v367_v42 }
 0x269   :  { %v335_v20 = vrot.slane %v334_v57, 4  ;;  %v344_v3 = vrot.slane %v343_v58, 4  ;;  %v382_v7 = vrot.slane %v381_v59, 4  ;;  %v391_v21 = vrot.slane %v390_v60, 4 }
 0x26b   :  { %v336_v16 = vadd.f32 %v335_v20, %v334_v57  ;;  %v345_v17 = vadd.f32 %v344_v3, %v343_v58  ;;  %v383_v22 = vmax.f32 %v381_v59, %v382_v7  ;;  %v392_v23 = vmax.f32 %v390_v60, %v391_v21 }
 0x26c   :  { %v560_v60 = vstv %s1205_s4  ;;  %s943_s4 = smov [#allocation8]  }
 0x26d   :  { %v337_v0 = vrot.slane %v336_v16, 2  ;;  %v346_v34 = vrot.slane %v345_v17, 2  ;;  %v384_v2 = vrot.slane %v383_v22, 2  ;;  %v393_v4 = vrot.slane %v392_v23, 2  ;;  %s810_s13 = sshll.u32 %s943_s4, 4  ;;  %s811_s13 = int_to_ptr.vmem [resolvable:$true] %s810_s13 }
 0x26f   :  { %v385_v11 = vmax.f32 %v383_v22, %v384_v2  ;;  %v394_v10 = vmax.f32 %v392_v23, %v393_v4  ;;  %v338_v12 = vadd.f32 %v337_v0, %v336_v16  ;;  %v347_v27 = vadd.f32 %v346_v34, %v345_v17 }
 0x271   :  { %v386_v43 = vrot.slane %v385_v11, 1  ;;  %v395_v44 = vrot.slane %v394_v10, 1  ;;  %v339_v6 = vrot.slane %v338_v12, 1  ;;  %v348_v13 = vrot.slane %v347_v27, 1 }
 0x273   :  { %v387_v49 = vmax.f32 %v385_v11, %v386_v43  ;;  %v396_v50 = vmax.f32 %v394_v10, %v395_v44  ;;  %v340_v51 = vadd.f32 %v339_v6, %v338_v12  ;;  %v349_v52 = vadd.f32 %v348_v13, %v347_v27 }
 0x275   :  { %v427_v55 = vsel %vm156_vm3, %v405_v14, %v387_v49  ;;  %v428_v56 = vsel %vm156_vm3, %v414_v48, %v396_v50  ;;  %v375_v57 = vmul.f32 %v374_v41, %v340_v51  ;;  %v376_v58 = vmul.f32 %v374_v41, %v349_v52 }
 0x276   :  { %617 = vmatmul.f32.vlgmr.msrb.gmra.mxu1 %v427_v55  ;;  %637 = vmatmul.f32.vlgmr.msrb.gmra.mxu0 %v428_v56 }
 0x277   :  { %v419_v45 = vsel %vm156_vm3, %v377_v53, %v375_v57  ;;  %v420_v59 = vsel %vm156_vm3, %v378_v18, %v376_v58 }
 0x278   :  { %577 = vmatmul.f32.vlgmr.msra.gmra.mxu2 %v419_v45  ;;  %597 = vmatmul.f32.vlgmr.msra.gmra.mxu3 %v420_v59 }
 0x27e   :  { %697 = vmatmul.f32.vlgmr.msra.gmra.mxu1 %v427_v55  ;;  %717 = vmatmul.f32.vlgmr.msra.gmra.mxu0 %v428_v56 }
 0x280   :  { %657 = vmatmul.f32.vlgmr.msrb.gmra.mxu2 %v419_v45  ;;  %677 = vmatmul.f32.vlgmr.msrb.gmra.mxu3 %v420_v59 }
 0x2f3   :  { %v618_v20 = vpop.f32.mrf.mxu1  ;;  %v638_v7 = vpop.f32.mrf.mxu0 }
 0x2fb   :  { %v578_v61 = vpop.f32.mrf.mxu2  ;;  %v598_v62 = vpop.f32.mrf.mxu3 }
 0x2fc   :  { %v579_v63 = vadd.f32 %v578_v61, %v560_v60  ;;  %v698_v24 = vpop.f32.mrf.mxu1  ;;  %v718_v31 = vpop.f32.mrf.mxu0 }
 0x2fe   :  { %v599_v3 = vadd.f32 %v598_v62, %v579_v63 }
 0x300   :  { %v619_v21 = vadd.f32 %v618_v20, %v599_v3 }
 0x302   :  { %v639_v8 = vadd.f32 %v638_v7, %v619_v21 }
 0x303   :  { %v658_v15 = vpop.f32.mrf.mxu2  ;;  %v678_v22 = vpop.f32.mrf.mxu3 }
 0x304   :  { %v830_v16 = vmul.f32 -1.442695, %v639_v8  ;;  %v659_v17 = vadd.f32 %v658_v15, %v560_v60 }
 0x306   :  { %852 = vpow2.f32 %v830_v16  ;;  %v679_v23 = vadd.f32 %v678_v22, %v659_v17 }
 0x308   :  { %v699_v30 = vadd.f32 %v698_v24, %v679_v23 }
 0x30a   :  { %v719_v0 = vadd.f32 %v718_v31, %v699_v30 }
 0x30c   :  { %v853_v34 = vpop.eup %852  ;;  %v831_v2 = vmul.f32 -1.442695, %v719_v0 }
 0x30d   :  { %v727_v4 = vadd.f32 1.0, %v853_v34 }
 0x30e   :  { %854 = vpow2.f32 %v831_v2 }
 0x30f   :  { %856 = vrcp.f32 %v727_v4  ;;  %vm734_vm15 = vweird.f32 %v727_v4  ;;  %v740_v14 = vand.u32 2147483648, %v727_v4  ;;  %v738_v48 = vand.u32 2147483647, %v727_v4 }
 0x311   :  { %v741_v53 = vor.u32 1.1754944e-38, %v740_v14  ;;  %vm739_vm6 = vcmp.eq.f32.partialorder %v738_v48, 8.507059e+37 }
 0x314   :  { %v855_v37 = vpop.eup %854 }
 0x315   :  { %v857_v9 = vpop.eup %856  ;;  %v728_v11 = vadd.f32 1.0, %v855_v37 }
 0x316   :  { %v730_v10 = vmul.f32 %v857_v9, %v727_v4  ;;  %vm735_vm13 = vweird.f32 %v857_v9 }
 0x317   :  { %858 = vrcp.f32 %v728_v11  ;;  %v755_v43 = vand.u32 2147483648, %v728_v11  ;;  %v753_v13 = vand.u32 2147483647, %v728_v11  ;;  %vm736_vm0 = vmor %vm734_vm15, %vm735_vm13  ;;  %vm749_vm1 = vweird.f32 %v728_v11 }
 0x318   :  { %v731_v12 = vsub.f32 1.0, %v730_v10 }
 0x319   :  { %v756_v50 = vor.u32 1.1754944e-38, %v755_v43  ;;  %vm754_vm4 = vcmp.eq.f32.partialorder %v753_v13, 8.507059e+37 }
 0x31a   :  { %v732_v5 = vmul.f32 %v857_v9, %v731_v12 }
 0x31c   :  { %v733_v44 = vadd.f32 %v857_v9, %v732_v5 }
 0x31d   :  { %v859_v27 = vpop.eup %858 }
 0x31e   :  { %v745_v41 = vmul.f32 %v859_v27, %v728_v11  ;;  %vm750_vm14 = vweird.f32 %v859_v27  ;;  %v737_v51 = vsel %vm736_vm0, %v857_v9, %v733_v44 }
 0x31f   :  { %vm751_vm2 = vmor %vm749_vm1, %vm750_vm14  ;;  %v742_v56 = vsel %vm739_vm6, %v741_v53, %v737_v51 }
 0x320   :  { %v746_v42 = vsub.f32 1.0, %v745_v41 }
 0x322   :  { %v747_v6 = vmul.f32 %v859_v27, %v746_v42 }
 0x324   :  { %v748_v49 = vadd.f32 %v859_v27, %v747_v6 }
 0x326   :  { %v752_v52 = vsel %vm751_vm2, %v859_v27, %v748_v49 }
 0x327   :  { %v757_v18 = vsel %vm754_vm4, %v756_v50, %v752_v52 }
 0x328   :  { %v761_v55 = vrot.slane %v757_v18, 7 }
 0x32a   :  { %v763_v57 = vsel %vm762_vm5, %v742_v56, %v761_v55  ;;  %v764_v58 = vsel %vm156_vm3, %v742_v56, %v761_v55 }
 0x32b   :  { %v765_v45 = vrot.slane %v764_v58, 1  ;;  %v766_v59 = vperm.slane %v763_v57, 0  ;;  %v767_v60 = vperm.slane %v763_v57, 1 }
 0x32d   :  { %v774_v61 = vmul.f32 %v766_v59, %v1125_v28  ;;  %v775_v62 = vmul.f32 %v767_v60, %v1128_v29  ;;  %v776_v63 = vmul.f32 %v766_v59, %v1132_v1  ;;  %v777_v20 = vmul.f32 %v767_v60, %v1136_v35 }
 0x32e   :  { %v768_v3 = vperm.slane %v765_v45, 0  ;;  %v778_v7 = vmul.f32 %v766_v59, %v1139_v36  ;;  %v769_v21 = vperm.slane %v765_v45, 1  ;;  %v779_v8 = vmul.f32 %v767_v60, %v1143_v38 }
 0x32f   :  { %790 = vst [vmem:[#allocation8] sm:$0xff] %v774_v61  ;;  %v780_v15 = vmul.f32 %v766_v59, %v1158_v19  ;;  %v781_v16 = vmul.f32 %v767_v60, %v1161_v54 }
 0x330   :  { %791 = vst [vmem:[#allocation8 + $0x8] sm:$0xff] %v775_v62  ;;  %v782_v28 = vmul.f32 %v768_v3, %v1083_v25  ;;  %v783_v29 = vmul.f32 %v769_v21, %v1086_v26  ;;  %v784_v1 = vmul.f32 %v768_v3, %v1089_v32  ;;  %v785_v35 = vmul.f32 %v769_v21, %v1092_v33 }
 0x331   :  { %792 = vst [vmem:[#allocation8 + $0x10] sm:$0xff] %v776_v63  ;;  %v786_v36 = vmul.f32 %v768_v3, %v1101_v39  ;;  %v787_v38 = vmul.f32 %v769_v21, %v1104_v40  ;;  %v788_v19 = vmul.f32 %v768_v3, %v1109_v46  ;;  %v789_v25 = vmul.f32 %v769_v21, %v1112_v47 }
 0x332   :  { %793 = vst [vmem:[#allocation8 + $0x18] sm:$0xff] %v777_v20 }
 0x333   :  { %794 = vst [vmem:[#allocation8 + $0x20] sm:$0xff] %v778_v7 }
 0x334   :  { %795 = vst [vmem:[#allocation8 + $0x28] sm:$0xff] %v779_v8 }
 0x335   :  { %796 = vst [vmem:[#allocation8 + $0x30] sm:$0xff] %v780_v15 }
 0x336   :  { %797 = vst [vmem:[#allocation8 + $0x38] sm:$0xff] %v781_v16 }
 0x337   :  { %798 = vst [vmem:[#allocation8 + $0x40] sm:$0xff] %v782_v28 }
 0x338   :  { %799 = vst [vmem:[#allocation8 + $0x48] sm:$0xff] %v783_v29 }
 0x339   :  { %800 = vst [vmem:[#allocation8 + $0x50] sm:$0xff] %v784_v1 }
 0x33a   :  { %801 = vst [vmem:[#allocation8 + $0x58] sm:$0xff] %v785_v35 }
 0x33b   :  { %802 = vst [vmem:[#allocation8 + $0x60] sm:$0xff] %v786_v36 }
 0x33c   :  { %803 = vst [vmem:[#allocation8 + $0x68] sm:$0xff] %v787_v38 }
 0x33d   :  { %804 = vst [vmem:[#allocation8 + $0x70] sm:$0xff] %v788_v19 }
 0x33e   :  { %805 = vst [vmem:[#allocation8 + $0x78] sm:$0xff] %v789_v25 }
 0x33f   :  { %818 = dma.vmem_to_hbm [thread:$0]  %s811_s13, 2048, %s813_s16, [#allocation5], %s939_s26, %s939_s26, %s940_s27  }
 0x340   :  { %936 = dma.done.wait [#allocation5], 2048  }
 0x341   :  { %937 = vsyncadd [#allocation5], 4294965248 }
 0x342   :  { %823 = vsyncpa [#allocation4], 1 }
 0x343   :  { %824 = vsyncpa [#allocation7], 1 }
 0x344   :  { %825 = vsyncpa [#allocation5], 1 }

</bundles_post_ra>
